<compile_context>
chip_gen: v7x
topology: tpu7x:2x2x1
jax: 0.10.0
libtpu: 0.0.40
codegen_flags: <defaults>
</compile_context>

<pallas_src>
import functools

import numpy as np
import jax
import jax.numpy as jnp
from jax.experimental import pallas as pl
from jax.experimental.pallas import tpu as pltpu  # noqa: F401  (kept for TPU-specific scaling knobs)


# ----------------------------------------------------------------------------
# Fused kernel: all LSTM layers + fused FC head, single pallas_call, grid=().
# PyTorch gate order: i, f, g, o;  c = f*c + i*g;  h = o*tanh(c);  h0=c0=0.
# ----------------------------------------------------------------------------
def _fused_lstm_kernel(num_layers, seq_len, batch, hidden, x_ref, *refs):
    """refs layout:
       per layer l: wih_t (Din_l,4H), whh_t (H,4H) bf16, b (1,4H) f32
       then: fc_wt (H,1), fc_b (1,1)
       then: out_ref (num_layers*B, 1)."""
    L, S, B, H = num_layers, seq_len, batch, hidden
    layer_refs = [refs[3 * l: 3 * l + 3] for l in range(L)]
    fc_wt_ref = refs[3 * L]
    fc_b_ref = refs[3 * L + 1]
    out_ref = refs[3 * L + 2]

    def lstm_step(x_part, h_prev, c_prev, whh_bf16):
        """x_part: (B,4H) f32 input-projection contribution (bias already folded in).
           One MXU dot + one full-width tanh per step; gates recovered with cheap
           per-lane affine (weights were pre-scaled so no in-kernel 0.5*z is needed)."""
        z = x_part + jnp.dot(h_prev.astype(jnp.bfloat16), whh_bf16,
                             preferred_element_type=jnp.float32)      # (B, 4H)
        t4 = jnp.tanh(z)                                              # 1 EUP op for all gates
        i_t = 0.5 * t4[:, 0 * H:1 * H] + 0.5      # == sigmoid(z_i)  (rows pre-scaled by 0.5)
        f_t = 0.5 * t4[:, 1 * H:2 * H] + 0.5      # == sigmoid(z_f)
        g_t = t4[:, 2 * H:3 * H]                  # == tanh(z_g)     (rows unscaled)
        o_t = 0.5 * t4[:, 3 * H:4 * H] + 0.5      # == sigmoid(z_o)
        c_new = f_t * c_prev + i_t * g_t
        h_new = o_t * jnp.tanh(c_new)
        return h_new, c_new

    finals = []

    # --- Layer 0: hoisted whole-sequence input projection (one MXU dot). -----
    wih_ref, whh_ref, b_ref = layer_refs[0]
    whh = whh_ref[...]                                               # (H,4H) bf16
    xp = (jnp.dot(x_ref[...], wih_ref[...], preferred_element_type=jnp.float32)
          + b_ref[...])                                              # (S*B, 4H), bias folded once
    # Per-step row extraction is independent of the recurrence (off the chain).
    xparts = [xp[t * B:(t + 1) * B, :] for t in range(S)]

    h = jnp.zeros((B, H), jnp.float32)
    c = jnp.zeros((B, H), jnp.float32)
    layer_out = []                                                   # h(t), stays in vregs
    for t in range(S):
        h, c = lstm_step(xparts[t], h, c, whh)
        layer_out.append(h)
    finals.append(h)

    # --- Layers >= 1: per-step input projection on the previous layer's h(t).
    #     Layer l step t only depends on layer l-1 step t  ->  wavefront
    #     schedulable DAG; no sequence buffer / HBM or VMEM round trip. --------
    for l in range(1, L):
        wih_ref, whh_ref, b_ref = layer_refs[l]
        wih = wih_ref[...]                                           # (H,4H) bf16
        whh = whh_ref[...]                                           # (H,4H) bf16
        bias = b_ref[...]                                            # (1,4H) f32
        h = jnp.zeros((B, H), jnp.float32)
        c = jnp.zeros((B, H), jnp.float32)
        new_out = []
        for t in range(S):
            x_part = (jnp.dot(layer_out[t].astype(jnp.bfloat16), wih,
                              preferred_element_type=jnp.float32) + bias)
            h, c = lstm_step(x_part, h, c, whh)
            new_out.append(h)
        layer_out = new_out
        finals.append(h)

    # --- FC head, once:  relu(relu(hn)) == relu(hn);  hn rows ordered like
    #     hn.view(-1, H) (layer-major).  Single dot + single store. ------------
    hn = jnp.maximum(jnp.concatenate(finals, axis=0), 0.0)           # (L*B, H)
    out_ref[...] = (jnp.dot(hn, fc_wt_ref[...], preferred_element_type=jnp.float32)
                    + fc_b_ref[...])


# ----------------------------------------------------------------------------
# Parameters: PyTorch layout -> kernel layout (done ONCE, not per forward call)
# ----------------------------------------------------------------------------
def init_params(key, input_size, hidden_size, num_layers):
    """PyTorch-style uniform(-1/sqrt(H), 1/sqrt(H)) init, PyTorch layout."""
    k = 1.0 / float(np.sqrt(hidden_size))
    params = {"layers": []}
    for layer in range(num_layers):
        d_in = input_size if layer == 0 else hidden_size
        key, k1, k2, k3, k4 = jax.random.split(key, 5)
        params["layers"].append({
            "w_ih": jax.random.uniform(k1, (4 * hidden_size, d_in), jnp.float32, -k, k),
            "w_hh": jax.random.uniform(k2, (4 * hidden_size, hidden_size), jnp.float32, -k, k),
            "b_ih": jax.random.uniform(k3, (4 * hidden_size,), jnp.float32, -k, k),
            "b_hh": jax.random.uniform(k4, (4 * hidden_size,), jnp.float32, -k, k),
        })
    key, k5, k6 = jax.random.split(key, 3)
    params["fc_w"] = jax.random.uniform(k5, (1, hidden_size), jnp.float32, -k, k)
    params["fc_b"] = jax.random.uniform(k6, (1,), jnp.float32, -k, k)
    return params


def prepare_params(params, hidden_size):
    """Pre-transpose W_ih, build lane-dense (H,4H) W_hh, pre-sum biases, pre-scale
       the sigmoid-gate rows by 0.5 (single-tanh gate trick), pre-cast the
       per-step matmul operands to bf16."""
    H = hidden_size
    # gate order i, f, g, o: sigmoid gates scaled 0.5, tanh gate unscaled.
    scale = np.concatenate([np.full(H, 0.5), np.full(H, 0.5),
                            np.full(H, 1.0), np.full(H, 0.5)]).astype(np.float32)
    layers = []
    for idx, lp in enumerate(params["layers"]):
        w_ih = np.asarray(lp["w_ih"], np.float32) * scale[:, None]   # (4H, Din)
        w_hh = np.asarray(lp["w_hh"], np.float32) * scale[:, None]   # (4H, H)
        b = (np.asarray(lp["b_ih"], np.float32)
             + np.asarray(lp["b_hh"], np.float32)) * scale
        layers.append({
            # layer 0's input projection is hoisted over the whole sequence (kept
            # f32); deeper layers' per-step input dots use bf16 (MXU native).
            "wih_t": jnp.asarray(w_ih.T, jnp.float32 if idx == 0 else jnp.bfloat16),
            "whh_t": jnp.asarray(w_hh.T, jnp.bfloat16),               # (H, 4H) lane-dense
            "b": jnp.asarray(b.reshape(1, 4 * H), jnp.float32),
        })
    return {
        "layers": layers,
        "fc_wt": jnp.asarray(params["fc_w"], jnp.float32).T,          # (H, 1)
        "fc_b": jnp.asarray(params["fc_b"], jnp.float32).reshape(1, 1),
    }


# ----------------------------------------------------------------------------
# Forward wrapper
# ----------------------------------------------------------------------------
@jax.jit
def lstm_forward(prepared, x):
    """x: (batch, seq, input_size) -> (num_layers * batch, 1)."""
    B, S, Din = x.shape
    H = prepared["fc_wt"].shape[0]
    L = len(prepared["layers"])

    # batch_first -> time-major glue (layout only; all compute is in the kernel).
    x_tm = jnp.transpose(x, (1, 0, 2)).reshape(S * B, Din).astype(jnp.float32)

    args = [x_tm]
    for lp in prepared["layers"]:
        args += [lp["wih_t"], lp["whh_t"], lp["b"]]
    args += [prepared["fc_wt"], prepared["fc_b"]]

    kernel = functools.partial(_fused_lstm_kernel, L, S, B, H)
    return pl.pallas_call(
        kernel,
        out_shape=jax.ShapeDtypeStruct((L * B, 1), jnp.float32),
    )(*args)


# ----------------------------------------------------------------------------
# Pure-NumPy reference (float64) with PyTorch LSTM semantics, for a self-check
# ----------------------------------------------------------------------------
def _reference_forward(params, x):
    xr = np.asarray(x, np.float64)
    B, S, _ = xr.shape
    H = np.asarray(params["fc_w"]).shape[1]

    def sig(z):
        return 1.0 / (1.0 + np.exp(-z))

    hns = []
    layer_in = xr
    for lp in params["layers"]:
        w_ih = np.asarray(lp["w_ih"], np.float64)
        w_hh = np.asarray(lp["w_hh"], np.float64)
        b = np.asarray(lp["b_ih"], np.float64) + np.asarray(lp["b_hh"], np.float64)
        h = np.zeros((B, H))
        c = np.zeros((B, H))
        ys = np.zeros((B, S, H))
        for t in range(S):
            g = layer_in[:, t, :] @ w_ih.T + h @ w_hh.T + b
            i = sig(g[:, 0:H]); f = sig(g[:, H:2 * H])
            gg = np.tanh(g[:, 2 * H:3 * H]); o = sig(g[:, 3 * H:4 * H])
            c = f * c + i * gg
            h = o * np.tanh(c)
            ys[:, t, :] = h
        hns.append(h)
        layer_in = ys
    hn = np.concatenate(hns, axis=0)                    # (L*B, H)
    return (np.maximum(hn, 0.0) @ np.asarray(params["fc_w"], np.float64).T
            + np.asarray(params["fc_b"], np.float64))


if __name__ == "__main__":
    input_size = 4
    hidden_size = 32
    num_layers = 2
    seq_length = 8
    batch = 2

    key = jax.random.PRNGKey(0)
    key_p, key_x = jax.random.split(key)
    params = init_params(key_p, input_size, hidden_size, num_layers)
    prepared = prepare_params(params, hidden_size)
    x = jax.random.normal(key_x, (batch, seq_length, input_size), jnp.float32)

    out = lstm_forward(prepared, x)
    jax.block_until_ready(out)
    assert out.shape == (num_layers * batch, 1), out.shape

    ref = _reference_forward(params, np.asarray(x))
    # bf16 MXU operands on the recurrent chain -> slightly looser tolerance than
    # pure-f32; any semantic bug would be ~1e-1, far above this.
    np.testing.assert_allclose(np.asarray(out), ref, rtol=5e-3, atol=5e-3)

    print("KERNEL_OK")
</pallas_src>

<mosaic_0001>
module attributes {stable_mosaic.version = 11 : i64} {
  func.func @_fused_lstm_kernel(%arg0: memref<16x4xf32, #tpu.memory_space<vmem>>, %arg1: memref<4x128xf32, #tpu.memory_space<vmem>>, %arg2: memref<32x128xbf16, #tpu.memory_space<vmem>>, %arg3: memref<1x128xf32, #tpu.memory_space<vmem>>, %arg4: memref<32x128xbf16, #tpu.memory_space<vmem>>, %arg5: memref<32x128xbf16, #tpu.memory_space<vmem>>, %arg6: memref<1x128xf32, #tpu.memory_space<vmem>>, %arg7: memref<32x1xf32, #tpu.memory_space<vmem>>, %arg8: memref<1x1xf32, #tpu.memory_space<vmem>>, %arg9: memref<4x1xf32, #tpu.memory_space<vmem>>) attributes {dimension_semantics = [], scalar_prefetch = 0 : i64, scratch_operands = 0 : i64, tpu.core_type = #tpu.core_type<tc>} {
    %c0 = arith.constant 0 : index
    %c0_0 = arith.constant 0 : index
    %0 = vector.load %arg2[%c0, %c0_0] : memref<32x128xbf16, #tpu.memory_space<vmem>>, vector<32x128xbf16>
    %c0_1 = arith.constant 0 : index
    %c0_2 = arith.constant 0 : index
    %1 = vector.load %arg0[%c0_1, %c0_2] : memref<16x4xf32, #tpu.memory_space<vmem>>, vector<16x4xf32>
    %c0_3 = arith.constant 0 : index
    %c0_4 = arith.constant 0 : index
    %2 = vector.load %arg1[%c0_3, %c0_4] : memref<4x128xf32, #tpu.memory_space<vmem>>, vector<4x128xf32>
    %cst = arith.constant dense<0.000000e+00> : vector<16x128xf32>
    %3 = tpu.matmul %1, %2, %cst {dimension_numbers = #tpu.dot_dimension_numbers<[1], [0], [0], [1], [0, 0, 1, 1], [], []>} : vector<16x4xf32>, vector<4x128xf32>, vector<16x128xf32> -> vector<16x128xf32>
    %c0_5 = arith.constant 0 : index
    %c0_6 = arith.constant 0 : index
    %4 = vector.load %arg3[%c0_5, %c0_6] : memref<1x128xf32, #tpu.memory_space<vmem>>, vector<1x128xf32>
    %5 = vector.broadcast %4 : vector<1x128xf32> to vector<16x128xf32>
    %6 = arith.addf %3, %5 : vector<16x128xf32>
    %7 = vector.extract_strided_slice %6 {offsets = [0, 0], sizes = [2, 128], strides = [1, 1]} : vector<16x128xf32> to vector<2x128xf32>
    %8 = vector.extract_strided_slice %6 {offsets = [2, 0], sizes = [2, 128], strides = [1, 1]} : vector<16x128xf32> to vector<2x128xf32>
    %9 = vector.extract_strided_slice %6 {offsets = [4, 0], sizes = [2, 128], strides = [1, 1]} : vector<16x128xf32> to vector<2x128xf32>
    %10 = vector.extract_strided_slice %6 {offsets = [6, 0], sizes = [2, 128], strides = [1, 1]} : vector<16x128xf32> to vector<2x128xf32>
    %11 = vector.extract_strided_slice %6 {offsets = [8, 0], sizes = [2, 128], strides = [1, 1]} : vector<16x128xf32> to vector<2x128xf32>
    %12 = vector.extract_strided_slice %6 {offsets = [10, 0], sizes = [2, 128], strides = [1, 1]} : vector<16x128xf32> to vector<2x128xf32>
    %13 = vector.extract_strided_slice %6 {offsets = [12, 0], sizes = [2, 128], strides = [1, 1]} : vector<16x128xf32> to vector<2x128xf32>
    %14 = vector.extract_strided_slice %6 {offsets = [14, 0], sizes = [2, 128], strides = [1, 1]} : vector<16x128xf32> to vector<2x128xf32>
    %cst_7 = arith.constant 0.000000e+00 : f32
    %15 = vector.broadcast %cst_7 : f32 to vector<2x32xf32>
    %cst_8 = arith.constant 0.000000e+00 : f32
    %16 = vector.broadcast %cst_8 : f32 to vector<2x32xf32>
    %17 = arith.truncf %15 : vector<2x32xf32> to vector<2x32xbf16>
    %cst_9 = arith.constant dense<0.000000e+00> : vector<2x128xf32>
    %18 = tpu.matmul %17, %0, %cst_9 {dimension_numbers = #tpu.dot_dimension_numbers<[1], [0], [0], [1], [0, 0, 1, 1], [], []>} : vector<2x32xbf16>, vector<32x128xbf16>, vector<2x128xf32> -> vector<2x128xf32>
    %19 = arith.addf %7, %18 : vector<2x128xf32>
    %20 = math.tanh %19 : vector<2x128xf32>
    %21 = vector.extract_strided_slice %20 {offsets = [0, 0], sizes = [2, 32], strides = [1, 1]} : vector<2x128xf32> to vector<2x32xf32>
    %cst_10 = arith.constant 5.000000e-01 : f32
    %22 = vector.broadcast %cst_10 : f32 to vector<2x32xf32>
    %23 = arith.mulf %22, %21 : vector<2x32xf32>
    %cst_11 = arith.constant 5.000000e-01 : f32
    %24 = vector.broadcast %cst_11 : f32 to vector<2x32xf32>
    %25 = arith.addf %23, %24 : vector<2x32xf32>
    %26 = vector.extract_strided_slice %20 {offsets = [0, 32], sizes = [2, 32], strides = [1, 1]} : vector<2x128xf32> to vector<2x32xf32>
    %cst_12 = arith.constant 5.000000e-01 : f32
    %27 = vector.broadcast %cst_12 : f32 to vector<2x32xf32>
    %28 = arith.mulf %27, %26 : vector<2x32xf32>
    %cst_13 = arith.constant 5.000000e-01 : f32
    %29 = vector.broadcast %cst_13 : f32 to vector<2x32xf32>
    %30 = arith.addf %28, %29 : vector<2x32xf32>
    %31 = vector.extract_strided_slice %20 {offsets = [0, 64], sizes = [2, 32], strides = [1, 1]} : vector<2x128xf32> to vector<2x32xf32>
    %32 = vector.extract_strided_slice %20 {offsets = [0, 96], sizes = [2, 32], strides = [1, 1]} : vector<2x128xf32> to vector<2x32xf32>
    %cst_14 = arith.constant 5.000000e-01 : f32
    %33 = vector.broadcast %cst_14 : f32 to vector<2x32xf32>
    %34 = arith.mulf %33, %32 : vector<2x32xf32>
    %cst_15 = arith.constant 5.000000e-01 : f32
    %35 = vector.broadcast %cst_15 : f32 to vector<2x32xf32>
    %36 = arith.addf %34, %35 : vector<2x32xf32>
    %37 = arith.mulf %30, %16 : vector<2x32xf32>
    %38 = arith.mulf %25, %31 : vector<2x32xf32>
    %39 = arith.addf %37, %38 : vector<2x32xf32>
    %40 = math.tanh %39 : vector<2x32xf32>
    %41 = arith.mulf %36, %40 : vector<2x32xf32>
    %42 = arith.truncf %41 : vector<2x32xf32> to vector<2x32xbf16>
    %cst_16 = arith.constant dense<0.000000e+00> : vector<2x128xf32>
    %43 = tpu.matmul %42, %0, %cst_16 {dimension_numbers = #tpu.dot_dimension_numbers<[1], [0], [0], [1], [0, 0, 1, 1], [], []>} : vector<2x32xbf16>, vector<32x128xbf16>, vector<2x128xf32> -> vector<2x128xf32>
    %44 = arith.addf %8, %43 : vector<2x128xf32>
    %45 = math.tanh %44 : vector<2x128xf32>
    %46 = vector.extract_strided_slice %45 {offsets = [0, 0], sizes = [2, 32], strides = [1, 1]} : vector<2x128xf32> to vector<2x32xf32>
    %cst_17 = arith.constant 5.000000e-01 : f32
    %47 = vector.broadcast %cst_17 : f32 to vector<2x32xf32>
    %48 = arith.mulf %47, %46 : vector<2x32xf32>
    %cst_18 = arith.constant 5.000000e-01 : f32
    %49 = vector.broadcast %cst_18 : f32 to vector<2x32xf32>
    %50 = arith.addf %48, %49 : vector<2x32xf32>
    %51 = vector.extract_strided_slice %45 {offsets = [0, 32], sizes = [2, 32], strides = [1, 1]} : vector<2x128xf32> to vector<2x32xf32>
    %cst_19 = arith.constant 5.000000e-01 : f32
    %52 = vector.broadcast %cst_19 : f32 to vector<2x32xf32>
    %53 = arith.mulf %52, %51 : vector<2x32xf32>
    %cst_20 = arith.constant 5.000000e-01 : f32
    %54 = vector.broadcast %cst_20 : f32 to vector<2x32xf32>
    %55 = arith.addf %53, %54 : vector<2x32xf32>
    %56 = vector.extract_strided_slice %45 {offsets = [0, 64], sizes = [2, 32], strides = [1, 1]} : vector<2x128xf32> to vector<2x32xf32>
    %57 = vector.extract_strided_slice %45 {offsets = [0, 96], sizes = [2, 32], strides = [1, 1]} : vector<2x128xf32> to vector<2x32xf32>
    %cst_21 = arith.constant 5.000000e-01 : f32
    %58 = vector.broadcast %cst_21 : f32 to vector<2x32xf32>
    %59 = arith.mulf %58, %57 : vector<2x32xf32>
    %cst_22 = arith.constant 5.000000e-01 : f32
    %60 = vector.broadcast %cst_22 : f32 to vector<2x32xf32>
    %61 = arith.addf %59, %60 : vector<2x32xf32>
    %62 = arith.mulf %55, %39 : vector<2x32xf32>
    %63 = arith.mulf %50, %56 : vector<2x32xf32>
    %64 = arith.addf %62, %63 : vector<2x32xf32>
    %65 = math.tanh %64 : vector<2x32xf32>
    %66 = arith.mulf %61, %65 : vector<2x32xf32>
    %67 = arith.truncf %66 : vector<2x32xf32> to vector<2x32xbf16>
    %cst_23 = arith.constant dense<0.000000e+00> : vector<2x128xf32>
    %68 = tpu.matmul %67, %0, %cst_23 {dimension_numbers = #tpu.dot_dimension_numbers<[1], [0], [0], [1], [0, 0, 1, 1], [], []>} : vector<2x32xbf16>, vector<32x128xbf16>, vector<2x128xf32> -> vector<2x128xf32>
    %69 = arith.addf %9, %68 : vector<2x128xf32>
    %70 = math.tanh %69 : vector<2x128xf32>
    %71 = vector.extract_strided_slice %70 {offsets = [0, 0], sizes = [2, 32], strides = [1, 1]} : vector<2x128xf32> to vector<2x32xf32>
    %cst_24 = arith.constant 5.000000e-01 : f32
    %72 = vector.broadcast %cst_24 : f32 to vector<2x32xf32>
    %73 = arith.mulf %72, %71 : vector<2x32xf32>
    %cst_25 = arith.constant 5.000000e-01 : f32
    %74 = vector.broadcast %cst_25 : f32 to vector<2x32xf32>
    %75 = arith.addf %73, %74 : vector<2x32xf32>
    %76 = vector.extract_strided_slice %70 {offsets = [0, 32], sizes = [2, 32], strides = [1, 1]} : vector<2x128xf32> to vector<2x32xf32>
    %cst_26 = arith.constant 5.000000e-01 : f32
    %77 = vector.broadcast %cst_26 : f32 to vector<2x32xf32>
    %78 = arith.mulf %77, %76 : vector<2x32xf32>
    %cst_27 = arith.constant 5.000000e-01 : f32
    %79 = vector.broadcast %cst_27 : f32 to vector<2x32xf32>
    %80 = arith.addf %78, %79 : vector<2x32xf32>
    %81 = vector.extract_strided_slice %70 {offsets = [0, 64], sizes = [2, 32], strides = [1, 1]} : vector<2x128xf32> to vector<2x32xf32>
    %82 = vector.extract_strided_slice %70 {offsets = [0, 96], sizes = [2, 32], strides = [1, 1]} : vector<2x128xf32> to vector<2x32xf32>
    %cst_28 = arith.constant 5.000000e-01 : f32
    %83 = vector.broadcast %cst_28 : f32 to vector<2x32xf32>
    %84 = arith.mulf %83, %82 : vector<2x32xf32>
    %cst_29 = arith.constant 5.000000e-01 : f32
    %85 = vector.broadcast %cst_29 : f32 to vector<2x32xf32>
    %86 = arith.addf %84, %85 : vector<2x32xf32>
    %87 = arith.mulf %80, %64 : vector<2x32xf32>
    %88 = arith.mulf %75, %81 : vector<2x32xf32>
    %89 = arith.addf %87, %88 : vector<2x32xf32>
    %90 = math.tanh %89 : vector<2x32xf32>
    %91 = arith.mulf %86, %90 : vector<2x32xf32>
    %92 = arith.truncf %91 : vector<2x32xf32> to vector<2x32xbf16>
    %cst_30 = arith.constant dense<0.000000e+00> : vector<2x128xf32>
    %93 = tpu.matmul %92, %0, %cst_30 {dimension_numbers = #tpu.dot_dimension_numbers<[1], [0], [0], [1], [0, 0, 1, 1], [], []>} : vector<2x32xbf16>, vector<32x128xbf16>, vector<2x128xf32> -> vector<2x128xf32>
    %94 = arith.addf %10, %93 : vector<2x128xf32>
    %95 = math.tanh %94 : vector<2x128xf32>
    %96 = vector.extract_strided_slice %95 {offsets = [0, 0], sizes = [2, 32], strides = [1, 1]} : vector<2x128xf32> to vector<2x32xf32>
    %cst_31 = arith.constant 5.000000e-01 : f32
    %97 = vector.broadcast %cst_31 : f32 to vector<2x32xf32>
    %98 = arith.mulf %97, %96 : vector<2x32xf32>
    %cst_32 = arith.constant 5.000000e-01 : f32
    %99 = vector.broadcast %cst_32 : f32 to vector<2x32xf32>
    %100 = arith.addf %98, %99 : vector<2x32xf32>
    %101 = vector.extract_strided_slice %95 {offsets = [0, 32], sizes = [2, 32], strides = [1, 1]} : vector<2x128xf32> to vector<2x32xf32>
    %cst_33 = arith.constant 5.000000e-01 : f32
    %102 = vector.broadcast %cst_33 : f32 to vector<2x32xf32>
    %103 = arith.mulf %102, %101 : vector<2x32xf32>
    %cst_34 = arith.constant 5.000000e-01 : f32
    %104 = vector.broadcast %cst_34 : f32 to vector<2x32xf32>
    %105 = arith.addf %103, %104 : vector<2x32xf32>
    %106 = vector.extract_strided_slice %95 {offsets = [0, 64], sizes = [2, 32], strides = [1, 1]} : vector<2x128xf32> to vector<2x32xf32>
    %107 = vector.extract_strided_slice %95 {offsets = [0, 96], sizes = [2, 32], strides = [1, 1]} : vector<2x128xf32> to vector<2x32xf32>
    %cst_35 = arith.constant 5.000000e-01 : f32
    %108 = vector.broadcast %cst_35 : f32 to vector<2x32xf32>
    %109 = arith.mulf %108, %107 : vector<2x32xf32>
    %cst_36 = arith.constant 5.000000e-01 : f32
    %110 = vector.broadcast %cst_36 : f32 to vector<2x32xf32>
    %111 = arith.addf %109, %110 : vector<2x32xf32>
    %112 = arith.mulf %105, %89 : vector<2x32xf32>
    %113 = arith.mulf %100, %106 : vector<2x32xf32>
    %114 = arith.addf %112, %113 : vector<2x32xf32>
    %115 = math.tanh %114 : vector<2x32xf32>
    %116 = arith.mulf %111, %115 : vector<2x32xf32>
    %117 = arith.truncf %116 : vector<2x32xf32> to vector<2x32xbf16>
    %cst_37 = arith.constant dense<0.000000e+00> : vector<2x128xf32>
    %118 = tpu.matmul %117, %0, %cst_37 {dimension_numbers = #tpu.dot_dimension_numbers<[1], [0], [0], [1], [0, 0, 1, 1], [], []>} : vector<2x32xbf16>, vector<32x128xbf16>, vector<2x128xf32> -> vector<2x128xf32>
    %119 = arith.addf %11, %118 : vector<2x128xf32>
    %120 = math.tanh %119 : vector<2x128xf32>
    %121 = vector.extract_strided_slice %120 {offsets = [0, 0], sizes = [2, 32], strides = [1, 1]} : vector<2x128xf32> to vector<2x32xf32>
    %cst_38 = arith.constant 5.000000e-01 : f32
    %122 = vector.broadcast %cst_38 : f32 to vector<2x32xf32>
    %123 = arith.mulf %122, %121 : vector<2x32xf32>
    %cst_39 = arith.constant 5.000000e-01 : f32
    %124 = vector.broadcast %cst_39 : f32 to vector<2x32xf32>
    %125 = arith.addf %123, %124 : vector<2x32xf32>
    %126 = vector.extract_strided_slice %120 {offsets = [0, 32], sizes = [2, 32], strides = [1, 1]} : vector<2x128xf32> to vector<2x32xf32>
    %cst_40 = arith.constant 5.000000e-01 : f32
    %127 = vector.broadcast %cst_40 : f32 to vector<2x32xf32>
    %128 = arith.mulf %127, %126 : vector<2x32xf32>
    %cst_41 = arith.constant 5.000000e-01 : f32
    %129 = vector.broadcast %cst_41 : f32 to vector<2x32xf32>
    %130 = arith.addf %128, %129 : vector<2x32xf32>
    %131 = vector.extract_strided_slice %120 {offsets = [0, 64], sizes = [2, 32], strides = [1, 1]} : vector<2x128xf32> to vector<2x32xf32>
    %132 = vector.extract_strided_slice %120 {offsets = [0, 96], sizes = [2, 32], strides = [1, 1]} : vector<2x128xf32> to vector<2x32xf32>
    %cst_42 = arith.constant 5.000000e-01 : f32
    %133 = vector.broadcast %cst_42 : f32 to vector<2x32xf32>
    %134 = arith.mulf %133, %132 : vector<2x32xf32>
    %cst_43 = arith.constant 5.000000e-01 : f32
    %135 = vector.broadcast %cst_43 : f32 to vector<2x32xf32>
    %136 = arith.addf %134, %135 : vector<2x32xf32>
    %137 = arith.mulf %130, %114 : vector<2x32xf32>
    %138 = arith.mulf %125, %131 : vector<2x32xf32>
    %139 = arith.addf %137, %138 : vector<2x32xf32>
    %140 = math.tanh %139 : vector<2x32xf32>
    %141 = arith.mulf %136, %140 : vector<2x32xf32>
    %142 = arith.truncf %141 : vector<2x32xf32> to vector<2x32xbf16>
    %cst_44 = arith.constant dense<0.000000e+00> : vector<2x128xf32>
    %143 = tpu.matmul %142, %0, %cst_44 {dimension_numbers = #tpu.dot_dimension_numbers<[1], [0], [0], [1], [0, 0, 1, 1], [], []>} : vector<2x32xbf16>, vector<32x128xbf16>, vector<2x128xf32> -> vector<2x128xf32>
    %144 = arith.addf %12, %143 : vector<2x128xf32>
    %145 = math.tanh %144 : vector<2x128xf32>
    %146 = vector.extract_strided_slice %145 {offsets = [0, 0], sizes = [2, 32], strides = [1, 1]} : vector<2x128xf32> to vector<2x32xf32>
    %cst_45 = arith.constant 5.000000e-01 : f32
    %147 = vector.broadcast %cst_45 : f32 to vector<2x32xf32>
    %148 = arith.mulf %147, %146 : vector<2x32xf32>
    %cst_46 = arith.constant 5.000000e-01 : f32
    %149 = vector.broadcast %cst_46 : f32 to vector<2x32xf32>
    %150 = arith.addf %148, %149 : vector<2x32xf32>
    %151 = vector.extract_strided_slice %145 {offsets = [0, 32], sizes = [2, 32], strides = [1, 1]} : vector<2x128xf32> to vector<2x32xf32>
    %cst_47 = arith.constant 5.000000e-01 : f32
    %152 = vector.broadcast %cst_47 : f32 to vector<2x32xf32>
    %153 = arith.mulf %152, %151 : vector<2x32xf32>
    %cst_48 = arith.constant 5.000000e-01 : f32
    %154 = vector.broadcast %cst_48 : f32 to vector<2x32xf32>
    %155 = arith.addf %153, %154 : vector<2x32xf32>
    %156 = vector.extract_strided_slice %145 {offsets = [0, 64], sizes = [2, 32], strides = [1, 1]} : vector<2x128xf32> to vector<2x32xf32>
    %157 = vector.extract_strided_slice %145 {offsets = [0, 96], sizes = [2, 32], strides = [1, 1]} : vector<2x128xf32> to vector<2x32xf32>
    %cst_49 = arith.constant 5.000000e-01 : f32
    %158 = vector.broadcast %cst_49 : f32 to vector<2x32xf32>
    %159 = arith.mulf %158, %157 : vector<2x32xf32>
    %cst_50 = arith.constant 5.000000e-01 : f32
    %160 = vector.broadcast %cst_50 : f32 to vector<2x32xf32>
    %161 = arith.addf %159, %160 : vector<2x32xf32>
    %162 = arith.mulf %155, %139 : vector<2x32xf32>
    %163 = arith.mulf %150, %156 : vector<2x32xf32>
    %164 = arith.addf %162, %163 : vector<2x32xf32>
    %165 = math.tanh %164 : vector<2x32xf32>
    %166 = arith.mulf %161, %165 : vector<2x32xf32>
    %167 = arith.truncf %166 : vector<2x32xf32> to vector<2x32xbf16>
    %cst_51 = arith.constant dense<0.000000e+00> : vector<2x128xf32>
    %168 = tpu.matmul %167, %0, %cst_51 {dimension_numbers = #tpu.dot_dimension_numbers<[1], [0], [0], [1], [0, 0, 1, 1], [], []>} : vector<2x32xbf16>, vector<32x128xbf16>, vector<2x128xf32> -> vector<2x128xf32>
    %169 = arith.addf %13, %168 : vector<2x128xf32>
    %170 = math.tanh %169 : vector<2x128xf32>
    %171 = vector.extract_strided_slice %170 {offsets = [0, 0], sizes = [2, 32], strides = [1, 1]} : vector<2x128xf32> to vector<2x32xf32>
    %cst_52 = arith.constant 5.000000e-01 : f32
    %172 = vector.broadcast %cst_52 : f32 to vector<2x32xf32>
    %173 = arith.mulf %172, %171 : vector<2x32xf32>
    %cst_53 = arith.constant 5.000000e-01 : f32
    %174 = vector.broadcast %cst_53 : f32 to vector<2x32xf32>
    %175 = arith.addf %173, %174 : vector<2x32xf32>
    %176 = vector.extract_strided_slice %170 {offsets = [0, 32], sizes = [2, 32], strides = [1, 1]} : vector<2x128xf32> to vector<2x32xf32>
    %cst_54 = arith.constant 5.000000e-01 : f32
    %177 = vector.broadcast %cst_54 : f32 to vector<2x32xf32>
    %178 = arith.mulf %177, %176 : vector<2x32xf32>
    %cst_55 = arith.constant 5.000000e-01 : f32
    %179 = vector.broadcast %cst_55 : f32 to vector<2x32xf32>
    %180 = arith.addf %178, %179 : vector<2x32xf32>
    %181 = vector.extract_strided_slice %170 {offsets = [0, 64], sizes = [2, 32], strides = [1, 1]} : vector<2x128xf32> to vector<2x32xf32>
    %182 = vector.extract_strided_slice %170 {offsets = [0, 96], sizes = [2, 32], strides = [1, 1]} : vector<2x128xf32> to vector<2x32xf32>
    %cst_56 = arith.constant 5.000000e-01 : f32
    %183 = vector.broadcast %cst_56 : f32 to vector<2x32xf32>
    %184 = arith.mulf %183, %182 : vector<2x32xf32>
    %cst_57 = arith.constant 5.000000e-01 : f32
    %185 = vector.broadcast %cst_57 : f32 to vector<2x32xf32>
    %186 = arith.addf %184, %185 : vector<2x32xf32>
    %187 = arith.mulf %180, %164 : vector<2x32xf32>
    %188 = arith.mulf %175, %181 : vector<2x32xf32>
    %189 = arith.addf %187, %188 : vector<2x32xf32>
    %190 = math.tanh %189 : vector<2x32xf32>
    %191 = arith.mulf %186, %190 : vector<2x32xf32>
    %192 = arith.truncf %191 : vector<2x32xf32> to vector<2x32xbf16>
    %cst_58 = arith.constant dense<0.000000e+00> : vector<2x128xf32>
    %193 = tpu.matmul %192, %0, %cst_58 {dimension_numbers = #tpu.dot_dimension_numbers<[1], [0], [0], [1], [0, 0, 1, 1], [], []>} : vector<2x32xbf16>, vector<32x128xbf16>, vector<2x128xf32> -> vector<2x128xf32>
    %194 = arith.addf %14, %193 : vector<2x128xf32>
    %195 = math.tanh %194 : vector<2x128xf32>
    %196 = vector.extract_strided_slice %195 {offsets = [0, 0], sizes = [2, 32], strides = [1, 1]} : vector<2x128xf32> to vector<2x32xf32>
    %cst_59 = arith.constant 5.000000e-01 : f32
    %197 = vector.broadcast %cst_59 : f32 to vector<2x32xf32>
    %198 = arith.mulf %197, %196 : vector<2x32xf32>
    %cst_60 = arith.constant 5.000000e-01 : f32
    %199 = vector.broadcast %cst_60 : f32 to vector<2x32xf32>
    %200 = arith.addf %198, %199 : vector<2x32xf32>
    %201 = vector.extract_strided_slice %195 {offsets = [0, 32], sizes = [2, 32], strides = [1, 1]} : vector<2x128xf32> to vector<2x32xf32>
    %cst_61 = arith.constant 5.000000e-01 : f32
    %202 = vector.broadcast %cst_61 : f32 to vector<2x32xf32>
    %203 = arith.mulf %202, %201 : vector<2x32xf32>
    %cst_62 = arith.constant 5.000000e-01 : f32
    %204 = vector.broadcast %cst_62 : f32 to vector<2x32xf32>
    %205 = arith.addf %203, %204 : vector<2x32xf32>
    %206 = vector.extract_strided_slice %195 {offsets = [0, 64], sizes = [2, 32], strides = [1, 1]} : vector<2x128xf32> to vector<2x32xf32>
    %207 = vector.extract_strided_slice %195 {offsets = [0, 96], sizes = [2, 32], strides = [1, 1]} : vector<2x128xf32> to vector<2x32xf32>
    %cst_63 = arith.constant 5.000000e-01 : f32
    %208 = vector.broadcast %cst_63 : f32 to vector<2x32xf32>
    %209 = arith.mulf %208, %207 : vector<2x32xf32>
    %cst_64 = arith.constant 5.000000e-01 : f32
    %210 = vector.broadcast %cst_64 : f32 to vector<2x32xf32>
    %211 = arith.addf %209, %210 : vector<2x32xf32>
    %212 = arith.mulf %205, %189 : vector<2x32xf32>
    %213 = arith.mulf %200, %206 : vector<2x32xf32>
    %214 = arith.addf %212, %213 : vector<2x32xf32>
    %215 = math.tanh %214 : vector<2x32xf32>
    %216 = arith.mulf %211, %215 : vector<2x32xf32>
    %c0_65 = arith.constant 0 : index
    %c0_66 = arith.constant 0 : index
    %217 = vector.load %arg4[%c0_65, %c0_66] : memref<32x128xbf16, #tpu.memory_space<vmem>>, vector<32x128xbf16>
    %c0_67 = arith.constant 0 : index
    %c0_68 = arith.constant 0 : index
    %218 = vector.load %arg5[%c0_67, %c0_68] : memref<32x128xbf16, #tpu.memory_space<vmem>>, vector<32x128xbf16>
    %c0_69 = arith.constant 0 : index
    %c0_70 = arith.constant 0 : index
    %219 = vector.load %arg6[%c0_69, %c0_70] : memref<1x128xf32, #tpu.memory_space<vmem>>, vector<1x128xf32>
    %cst_71 = arith.constant 0.000000e+00 : f32
    %220 = vector.broadcast %cst_71 : f32 to vector<2x32xf32>
    %cst_72 = arith.constant 0.000000e+00 : f32
    %221 = vector.broadcast %cst_72 : f32 to vector<2x32xf32>
    %222 = arith.truncf %41 : vector<2x32xf32> to vector<2x32xbf16>
    %cst_73 = arith.constant dense<0.000000e+00> : vector<2x128xf32>
    %223 = tpu.matmul %222, %217, %cst_73 {dimension_numbers = #tpu.dot_dimension_numbers<[1], [0], [0], [1], [0, 0, 1, 1], [], []>} : vector<2x32xbf16>, vector<32x128xbf16>, vector<2x128xf32> -> vector<2x128xf32>
    %224 = vector.broadcast %219 : vector<1x128xf32> to vector<2x128xf32>
    %225 = arith.addf %223, %224 : vector<2x128xf32>
    %226 = arith.truncf %220 : vector<2x32xf32> to vector<2x32xbf16>
    %cst_74 = arith.constant dense<0.000000e+00> : vector<2x128xf32>
    %227 = tpu.matmul %226, %218, %cst_74 {dimension_numbers = #tpu.dot_dimension_numbers<[1], [0], [0], [1], [0, 0, 1, 1], [], []>} : vector<2x32xbf16>, vector<32x128xbf16>, vector<2x128xf32> -> vector<2x128xf32>
    %228 = arith.addf %225, %227 : vector<2x128xf32>
    %229 = math.tanh %228 : vector<2x128xf32>
    %230 = vector.extract_strided_slice %229 {offsets = [0, 0], sizes = [2, 32], strides = [1, 1]} : vector<2x128xf32> to vector<2x32xf32>
    %cst_75 = arith.constant 5.000000e-01 : f32
    %231 = vector.broadcast %cst_75 : f32 to vector<2x32xf32>
    %232 = arith.mulf %231, %230 : vector<2x32xf32>
    %cst_76 = arith.constant 5.000000e-01 : f32
    %233 = vector.broadcast %cst_76 : f32 to vector<2x32xf32>
    %234 = arith.addf %232, %233 : vector<2x32xf32>
    %235 = vector.extract_strided_slice %229 {offsets = [0, 32], sizes = [2, 32], strides = [1, 1]} : vector<2x128xf32> to vector<2x32xf32>
    %cst_77 = arith.constant 5.000000e-01 : f32
    %236 = vector.broadcast %cst_77 : f32 to vector<2x32xf32>
    %237 = arith.mulf %236, %235 : vector<2x32xf32>
    %cst_78 = arith.constant 5.000000e-01 : f32
    %238 = vector.broadcast %cst_78 : f32 to vector<2x32xf32>
    %239 = arith.addf %237, %238 : vector<2x32xf32>
    %240 = vector.extract_strided_slice %229 {offsets = [0, 64], sizes = [2, 32], strides = [1, 1]} : vector<2x128xf32> to vector<2x32xf32>
    %241 = vector.extract_strided_slice %229 {offsets = [0, 96], sizes = [2, 32], strides = [1, 1]} : vector<2x128xf32> to vector<2x32xf32>
    %cst_79 = arith.constant 5.000000e-01 : f32
    %242 = vector.broadcast %cst_79 : f32 to vector<2x32xf32>
    %243 = arith.mulf %242, %241 : vector<2x32xf32>
    %cst_80 = arith.constant 5.000000e-01 : f32
    %244 = vector.broadcast %cst_80 : f32 to vector<2x32xf32>
    %245 = arith.addf %243, %244 : vector<2x32xf32>
    %246 = arith.mulf %239, %221 : vector<2x32xf32>
    %247 = arith.mulf %234, %240 : vector<2x32xf32>
    %248 = arith.addf %246, %247 : vector<2x32xf32>
    %249 = math.tanh %248 : vector<2x32xf32>
    %250 = arith.mulf %245, %249 : vector<2x32xf32>
    %251 = arith.truncf %66 : vector<2x32xf32> to vector<2x32xbf16>
    %cst_81 = arith.constant dense<0.000000e+00> : vector<2x128xf32>
    %252 = tpu.matmul %251, %217, %cst_81 {dimension_numbers = #tpu.dot_dimension_numbers<[1], [0], [0], [1], [0, 0, 1, 1], [], []>} : vector<2x32xbf16>, vector<32x128xbf16>, vector<2x128xf32> -> vector<2x128xf32>
    %253 = vector.broadcast %219 : vector<1x128xf32> to vector<2x128xf32>
    %254 = arith.addf %252, %253 : vector<2x128xf32>
    %255 = arith.truncf %250 : vector<2x32xf32> to vector<2x32xbf16>
    %cst_82 = arith.constant dense<0.000000e+00> : vector<2x128xf32>
    %256 = tpu.matmul %255, %218, %cst_82 {dimension_numbers = #tpu.dot_dimension_numbers<[1], [0], [0], [1], [0, 0, 1, 1], [], []>} : vector<2x32xbf16>, vector<32x128xbf16>, vector<2x128xf32> -> vector<2x128xf32>
    %257 = arith.addf %254, %256 : vector<2x128xf32>
    %258 = math.tanh %257 : vector<2x128xf32>
    %259 = vector.extract_strided_slice %258 {offsets = [0, 0], sizes = [2, 32], strides = [1, 1]} : vector<2x128xf32> to vector<2x32xf32>
    %cst_83 = arith.constant 5.000000e-01 : f32
    %260 = vector.broadcast %cst_83 : f32 to vector<2x32xf32>
    %261 = arith.mulf %260, %259 : vector<2x32xf32>
    %cst_84 = arith.constant 5.000000e-01 : f32
    %262 = vector.broadcast %cst_84 : f32 to vector<2x32xf32>
    %263 = arith.addf %261, %262 : vector<2x32xf32>
    %264 = vector.extract_strided_slice %258 {offsets = [0, 32], sizes = [2, 32], strides = [1, 1]} : vector<2x128xf32> to vector<2x32xf32>
    %cst_85 = arith.constant 5.000000e-01 : f32
    %265 = vector.broadcast %cst_85 : f32 to vector<2x32xf32>
    %266 = arith.mulf %265, %264 : vector<2x32xf32>
    %cst_86 = arith.constant 5.000000e-01 : f32
    %267 = vector.broadcast %cst_86 : f32 to vector<2x32xf32>
    %268 = arith.addf %266, %267 : vector<2x32xf32>
    %269 = vector.extract_strided_slice %258 {offsets = [0, 64], sizes = [2, 32], strides = [1, 1]} : vector<2x128xf32> to vector<2x32xf32>
    %270 = vector.extract_strided_slice %258 {offsets = [0, 96], sizes = [2, 32], strides = [1, 1]} : vector<2x128xf32> to vector<2x32xf32>
    %cst_87 = arith.constant 5.000000e-01 : f32
    %271 = vector.broadcast %cst_87 : f32 to vector<2x32xf32>
    %272 = arith.mulf %271, %270 : vector<2x32xf32>
    %cst_88 = arith.constant 5.000000e-01 : f32
    %273 = vector.broadcast %cst_88 : f32 to vector<2x32xf32>
    %274 = arith.addf %272, %273 : vector<2x32xf32>
    %275 = arith.mulf %268, %248 : vector<2x32xf32>
    %276 = arith.mulf %263, %269 : vector<2x32xf32>
    %277 = arith.addf %275, %276 : vector<2x32xf32>
    %278 = math.tanh %277 : vector<2x32xf32>
    %279 = arith.mulf %274, %278 : vector<2x32xf32>
    %280 = arith.truncf %91 : vector<2x32xf32> to vector<2x32xbf16>
    %cst_89 = arith.constant dense<0.000000e+00> : vector<2x128xf32>
    %281 = tpu.matmul %280, %217, %cst_89 {dimension_numbers = #tpu.dot_dimension_numbers<[1], [0], [0], [1], [0, 0, 1, 1], [], []>} : vector<2x32xbf16>, vector<32x128xbf16>, vector<2x128xf32> -> vector<2x128xf32>
    %282 = vector.broadcast %219 : vector<1x128xf32> to vector<2x128xf32>
    %283 = arith.addf %281, %282 : vector<2x128xf32>
    %284 = arith.truncf %279 : vector<2x32xf32> to vector<2x32xbf16>
    %cst_90 = arith.constant dense<0.000000e+00> : vector<2x128xf32>
    %285 = tpu.matmul %284, %218, %cst_90 {dimension_numbers = #tpu.dot_dimension_numbers<[1], [0], [0], [1], [0, 0, 1, 1], [], []>} : vector<2x32xbf16>, vector<32x128xbf16>, vector<2x128xf32> -> vector<2x128xf32>
    %286 = arith.addf %283, %285 : vector<2x128xf32>
    %287 = math.tanh %286 : vector<2x128xf32>
    %288 = vector.extract_strided_slice %287 {offsets = [0, 0], sizes = [2, 32], strides = [1, 1]} : vector<2x128xf32> to vector<2x32xf32>
    %cst_91 = arith.constant 5.000000e-01 : f32
    %289 = vector.broadcast %cst_91 : f32 to vector<2x32xf32>
    %290 = arith.mulf %289, %288 : vector<2x32xf32>
    %cst_92 = arith.constant 5.000000e-01 : f32
    %291 = vector.broadcast %cst_92 : f32 to vector<2x32xf32>
    %292 = arith.addf %290, %291 : vector<2x32xf32>
    %293 = vector.extract_strided_slice %287 {offsets = [0, 32], sizes = [2, 32], strides = [1, 1]} : vector<2x128xf32> to vector<2x32xf32>
    %cst_93 = arith.constant 5.000000e-01 : f32
    %294 = vector.broadcast %cst_93 : f32 to vector<2x32xf32>
    %295 = arith.mulf %294, %293 : vector<2x32xf32>
    %cst_94 = arith.constant 5.000000e-01 : f32
    %296 = vector.broadcast %cst_94 : f32 to vector<2x32xf32>
    %297 = arith.addf %295, %296 : vector<2x32xf32>
    %298 = vector.extract_strided_slice %287 {offsets = [0, 64], sizes = [2, 32], strides = [1, 1]} : vector<2x128xf32> to vector<2x32xf32>
    %299 = vector.extract_strided_slice %287 {offsets = [0, 96], sizes = [2, 32], strides = [1, 1]} : vector<2x128xf32> to vector<2x32xf32>
    %cst_95 = arith.constant 5.000000e-01 : f32
    %300 = vector.broadcast %cst_95 : f32 to vector<2x32xf32>
    %301 = arith.mulf %300, %299 : vector<2x32xf32>
    %cst_96 = arith.constant 5.000000e-01 : f32
    %302 = vector.broadcast %cst_96 : f32 to vector<2x32xf32>
    %303 = arith.addf %301, %302 : vector<2x32xf32>
    %304 = arith.mulf %297, %277 : vector<2x32xf32>
    %305 = arith.mulf %292, %298 : vector<2x32xf32>
    %306 = arith.addf %304, %305 : vector<2x32xf32>
    %307 = math.tanh %306 : vector<2x32xf32>
    %308 = arith.mulf %303, %307 : vector<2x32xf32>
    %309 = arith.truncf %116 : vector<2x32xf32> to vector<2x32xbf16>
    %cst_97 = arith.constant dense<0.000000e+00> : vector<2x128xf32>
    %310 = tpu.matmul %309, %217, %cst_97 {dimension_numbers = #tpu.dot_dimension_numbers<[1], [0], [0], [1], [0, 0, 1, 1], [], []>} : vector<2x32xbf16>, vector<32x128xbf16>, vector<2x128xf32> -> vector<2x128xf32>
    %311 = vector.broadcast %219 : vector<1x128xf32> to vector<2x128xf32>
    %312 = arith.addf %310, %311 : vector<2x128xf32>
    %313 = arith.truncf %308 : vector<2x32xf32> to vector<2x32xbf16>
    %cst_98 = arith.constant dense<0.000000e+00> : vector<2x128xf32>
    %314 = tpu.matmul %313, %218, %cst_98 {dimension_numbers = #tpu.dot_dimension_numbers<[1], [0], [0], [1], [0, 0, 1, 1], [], []>} : vector<2x32xbf16>, vector<32x128xbf16>, vector<2x128xf32> -> vector<2x128xf32>
    %315 = arith.addf %312, %314 : vector<2x128xf32>
    %316 = math.tanh %315 : vector<2x128xf32>
    %317 = vector.extract_strided_slice %316 {offsets = [0, 0], sizes = [2, 32], strides = [1, 1]} : vector<2x128xf32> to vector<2x32xf32>
    %cst_99 = arith.constant 5.000000e-01 : f32
    %318 = vector.broadcast %cst_99 : f32 to vector<2x32xf32>
    %319 = arith.mulf %318, %317 : vector<2x32xf32>
    %cst_100 = arith.constant 5.000000e-01 : f32
    %320 = vector.broadcast %cst_100 : f32 to vector<2x32xf32>
    %321 = arith.addf %319, %320 : vector<2x32xf32>
    %322 = vector.extract_strided_slice %316 {offsets = [0, 32], sizes = [2, 32], strides = [1, 1]} : vector<2x128xf32> to vector<2x32xf32>
    %cst_101 = arith.constant 5.000000e-01 : f32
    %323 = vector.broadcast %cst_101 : f32 to vector<2x32xf32>
    %324 = arith.mulf %323, %322 : vector<2x32xf32>
    %cst_102 = arith.constant 5.000000e-01 : f32
    %325 = vector.broadcast %cst_102 : f32 to vector<2x32xf32>
    %326 = arith.addf %324, %325 : vector<2x32xf32>
    %327 = vector.extract_strided_slice %316 {offsets = [0, 64], sizes = [2, 32], strides = [1, 1]} : vector<2x128xf32> to vector<2x32xf32>
    %328 = vector.extract_strided_slice %316 {offsets = [0, 96], sizes = [2, 32], strides = [1, 1]} : vector<2x128xf32> to vector<2x32xf32>
    %cst_103 = arith.constant 5.000000e-01 : f32
    %329 = vector.broadcast %cst_103 : f32 to vector<2x32xf32>
    %330 = arith.mulf %329, %328 : vector<2x32xf32>
    %cst_104 = arith.constant 5.000000e-01 : f32
    %331 = vector.broadcast %cst_104 : f32 to vector<2x32xf32>
    %332 = arith.addf %330, %331 : vector<2x32xf32>
    %333 = arith.mulf %326, %306 : vector<2x32xf32>
    %334 = arith.mulf %321, %327 : vector<2x32xf32>
    %335 = arith.addf %333, %334 : vector<2x32xf32>
    %336 = math.tanh %335 : vector<2x32xf32>
    %337 = arith.mulf %332, %336 : vector<2x32xf32>
    %338 = arith.truncf %141 : vector<2x32xf32> to vector<2x32xbf16>
    %cst_105 = arith.constant dense<0.000000e+00> : vector<2x128xf32>
    %339 = tpu.matmul %338, %217, %cst_105 {dimension_numbers = #tpu.dot_dimension_numbers<[1], [0], [0], [1], [0, 0, 1, 1], [], []>} : vector<2x32xbf16>, vector<32x128xbf16>, vector<2x128xf32> -> vector<2x128xf32>
    %340 = vector.broadcast %219 : vector<1x128xf32> to vector<2x128xf32>
    %341 = arith.addf %339, %340 : vector<2x128xf32>
    %342 = arith.truncf %337 : vector<2x32xf32> to vector<2x32xbf16>
    %cst_106 = arith.constant dense<0.000000e+00> : vector<2x128xf32>
    %343 = tpu.matmul %342, %218, %cst_106 {dimension_numbers = #tpu.dot_dimension_numbers<[1], [0], [0], [1], [0, 0, 1, 1], [], []>} : vector<2x32xbf16>, vector<32x128xbf16>, vector<2x128xf32> -> vector<2x128xf32>
    %344 = arith.addf %341, %343 : vector<2x128xf32>
    %345 = math.tanh %344 : vector<2x128xf32>
    %346 = vector.extract_strided_slice %345 {offsets = [0, 0], sizes = [2, 32], strides = [1, 1]} : vector<2x128xf32> to vector<2x32xf32>
    %cst_107 = arith.constant 5.000000e-01 : f32
    %347 = vector.broadcast %cst_107 : f32 to vector<2x32xf32>
    %348 = arith.mulf %347, %346 : vector<2x32xf32>
    %cst_108 = arith.constant 5.000000e-01 : f32
    %349 = vector.broadcast %cst_108 : f32 to vector<2x32xf32>
    %350 = arith.addf %348, %349 : vector<2x32xf32>
    %351 = vector.extract_strided_slice %345 {offsets = [0, 32], sizes = [2, 32], strides = [1, 1]} : vector<2x128xf32> to vector<2x32xf32>
    %cst_109 = arith.constant 5.000000e-01 : f32
    %352 = vector.broadcast %cst_109 : f32 to vector<2x32xf32>
    %353 = arith.mulf %352, %351 : vector<2x32xf32>
    %cst_110 = arith.constant 5.000000e-01 : f32
    %354 = vector.broadcast %cst_110 : f32 to vector<2x32xf32>
    %355 = arith.addf %353, %354 : vector<2x32xf32>
    %356 = vector.extract_strided_slice %345 {offsets = [0, 64], sizes = [2, 32], strides = [1, 1]} : vector<2x128xf32> to vector<2x32xf32>
    %357 = vector.extract_strided_slice %345 {offsets = [0, 96], sizes = [2, 32], strides = [1, 1]} : vector<2x128xf32> to vector<2x32xf32>
    %cst_111 = arith.constant 5.000000e-01 : f32
    %358 = vector.broadcast %cst_111 : f32 to vector<2x32xf32>
    %359 = arith.mulf %358, %357 : vector<2x32xf32>
    %cst_112 = arith.constant 5.000000e-01 : f32
    %360 = vector.broadcast %cst_112 : f32 to vector<2x32xf32>
    %361 = arith.addf %359, %360 : vector<2x32xf32>
    %362 = arith.mulf %355, %335 : vector<2x32xf32>
    %363 = arith.mulf %350, %356 : vector<2x32xf32>
    %364 = arith.addf %362, %363 : vector<2x32xf32>
    %365 = math.tanh %364 : vector<2x32xf32>
    %366 = arith.mulf %361, %365 : vector<2x32xf32>
    %367 = arith.truncf %166 : vector<2x32xf32> to vector<2x32xbf16>
    %cst_113 = arith.constant dense<0.000000e+00> : vector<2x128xf32>
    %368 = tpu.matmul %367, %217, %cst_113 {dimension_numbers = #tpu.dot_dimension_numbers<[1], [0], [0], [1], [0, 0, 1, 1], [], []>} : vector<2x32xbf16>, vector<32x128xbf16>, vector<2x128xf32> -> vector<2x128xf32>
    %369 = vector.broadcast %219 : vector<1x128xf32> to vector<2x128xf32>
    %370 = arith.addf %368, %369 : vector<2x128xf32>
    %371 = arith.truncf %366 : vector<2x32xf32> to vector<2x32xbf16>
    %cst_114 = arith.constant dense<0.000000e+00> : vector<2x128xf32>
    %372 = tpu.matmul %371, %218, %cst_114 {dimension_numbers = #tpu.dot_dimension_numbers<[1], [0], [0], [1], [0, 0, 1, 1], [], []>} : vector<2x32xbf16>, vector<32x128xbf16>, vector<2x128xf32> -> vector<2x128xf32>
    %373 = arith.addf %370, %372 : vector<2x128xf32>
    %374 = math.tanh %373 : vector<2x128xf32>
    %375 = vector.extract_strided_slice %374 {offsets = [0, 0], sizes = [2, 32], strides = [1, 1]} : vector<2x128xf32> to vector<2x32xf32>
    %cst_115 = arith.constant 5.000000e-01 : f32
    %376 = vector.broadcast %cst_115 : f32 to vector<2x32xf32>
    %377 = arith.mulf %376, %375 : vector<2x32xf32>
    %cst_116 = arith.constant 5.000000e-01 : f32
    %378 = vector.broadcast %cst_116 : f32 to vector<2x32xf32>
    %379 = arith.addf %377, %378 : vector<2x32xf32>
    %380 = vector.extract_strided_slice %374 {offsets = [0, 32], sizes = [2, 32], strides = [1, 1]} : vector<2x128xf32> to vector<2x32xf32>
    %cst_117 = arith.constant 5.000000e-01 : f32
    %381 = vector.broadcast %cst_117 : f32 to vector<2x32xf32>
    %382 = arith.mulf %381, %380 : vector<2x32xf32>
    %cst_118 = arith.constant 5.000000e-01 : f32
    %383 = vector.broadcast %cst_118 : f32 to vector<2x32xf32>
    %384 = arith.addf %382, %383 : vector<2x32xf32>
    %385 = vector.extract_strided_slice %374 {offsets = [0, 64], sizes = [2, 32], strides = [1, 1]} : vector<2x128xf32> to vector<2x32xf32>
    %386 = vector.extract_strided_slice %374 {offsets = [0, 96], sizes = [2, 32], strides = [1, 1]} : vector<2x128xf32> to vector<2x32xf32>
    %cst_119 = arith.constant 5.000000e-01 : f32
    %387 = vector.broadcast %cst_119 : f32 to vector<2x32xf32>
    %388 = arith.mulf %387, %386 : vector<2x32xf32>
    %cst_120 = arith.constant 5.000000e-01 : f32
    %389 = vector.broadcast %cst_120 : f32 to vector<2x32xf32>
    %390 = arith.addf %388, %389 : vector<2x32xf32>
    %391 = arith.mulf %384, %364 : vector<2x32xf32>
    %392 = arith.mulf %379, %385 : vector<2x32xf32>
    %393 = arith.addf %391, %392 : vector<2x32xf32>
    %394 = math.tanh %393 : vector<2x32xf32>
    %395 = arith.mulf %390, %394 : vector<2x32xf32>
    %396 = arith.truncf %191 : vector<2x32xf32> to vector<2x32xbf16>
    %cst_121 = arith.constant dense<0.000000e+00> : vector<2x128xf32>
    %397 = tpu.matmul %396, %217, %cst_121 {dimension_numbers = #tpu.dot_dimension_numbers<[1], [0], [0], [1], [0, 0, 1, 1], [], []>} : vector<2x32xbf16>, vector<32x128xbf16>, vector<2x128xf32> -> vector<2x128xf32>
    %398 = vector.broadcast %219 : vector<1x128xf32> to vector<2x128xf32>
    %399 = arith.addf %397, %398 : vector<2x128xf32>
    %400 = arith.truncf %395 : vector<2x32xf32> to vector<2x32xbf16>
    %cst_122 = arith.constant dense<0.000000e+00> : vector<2x128xf32>
    %401 = tpu.matmul %400, %218, %cst_122 {dimension_numbers = #tpu.dot_dimension_numbers<[1], [0], [0], [1], [0, 0, 1, 1], [], []>} : vector<2x32xbf16>, vector<32x128xbf16>, vector<2x128xf32> -> vector<2x128xf32>
    %402 = arith.addf %399, %401 : vector<2x128xf32>
    %403 = math.tanh %402 : vector<2x128xf32>
    %404 = vector.extract_strided_slice %403 {offsets = [0, 0], sizes = [2, 32], strides = [1, 1]} : vector<2x128xf32> to vector<2x32xf32>
    %cst_123 = arith.constant 5.000000e-01 : f32
    %405 = vector.broadcast %cst_123 : f32 to vector<2x32xf32>
    %406 = arith.mulf %405, %404 : vector<2x32xf32>
    %cst_124 = arith.constant 5.000000e-01 : f32
    %407 = vector.broadcast %cst_124 : f32 to vector<2x32xf32>
    %408 = arith.addf %406, %407 : vector<2x32xf32>
    %409 = vector.extract_strided_slice %403 {offsets = [0, 32], sizes = [2, 32], strides = [1, 1]} : vector<2x128xf32> to vector<2x32xf32>
    %cst_125 = arith.constant 5.000000e-01 : f32
    %410 = vector.broadcast %cst_125 : f32 to vector<2x32xf32>
    %411 = arith.mulf %410, %409 : vector<2x32xf32>
    %cst_126 = arith.constant 5.000000e-01 : f32
    %412 = vector.broadcast %cst_126 : f32 to vector<2x32xf32>
    %413 = arith.addf %411, %412 : vector<2x32xf32>
    %414 = vector.extract_strided_slice %403 {offsets = [0, 64], sizes = [2, 32], strides = [1, 1]} : vector<2x128xf32> to vector<2x32xf32>
    %415 = vector.extract_strided_slice %403 {offsets = [0, 96], sizes = [2, 32], strides = [1, 1]} : vector<2x128xf32> to vector<2x32xf32>
    %cst_127 = arith.constant 5.000000e-01 : f32
    %416 = vector.broadcast %cst_127 : f32 to vector<2x32xf32>
    %417 = arith.mulf %416, %415 : vector<2x32xf32>
    %cst_128 = arith.constant 5.000000e-01 : f32
    %418 = vector.broadcast %cst_128 : f32 to vector<2x32xf32>
    %419 = arith.addf %417, %418 : vector<2x32xf32>
    %420 = arith.mulf %413, %393 : vector<2x32xf32>
    %421 = arith.mulf %408, %414 : vector<2x32xf32>
    %422 = arith.addf %420, %421 : vector<2x32xf32>
    %423 = math.tanh %422 : vector<2x32xf32>
    %424 = arith.mulf %419, %423 : vector<2x32xf32>
    %425 = arith.truncf %216 : vector<2x32xf32> to vector<2x32xbf16>
    %cst_129 = arith.constant dense<0.000000e+00> : vector<2x128xf32>
    %426 = tpu.matmul %425, %217, %cst_129 {dimension_numbers = #tpu.dot_dimension_numbers<[1], [0], [0], [1], [0, 0, 1, 1], [], []>} : vector<2x32xbf16>, vector<32x128xbf16>, vector<2x128xf32> -> vector<2x128xf32>
    %427 = vector.broadcast %219 : vector<1x128xf32> to vector<2x128xf32>
    %428 = arith.addf %426, %427 : vector<2x128xf32>
    %429 = arith.truncf %424 : vector<2x32xf32> to vector<2x32xbf16>
    %cst_130 = arith.constant dense<0.000000e+00> : vector<2x128xf32>
    %430 = tpu.matmul %429, %218, %cst_130 {dimension_numbers = #tpu.dot_dimension_numbers<[1], [0], [0], [1], [0, 0, 1, 1], [], []>} : vector<2x32xbf16>, vector<32x128xbf16>, vector<2x128xf32> -> vector<2x128xf32>
    %431 = arith.addf %428, %430 : vector<2x128xf32>
    %432 = math.tanh %431 : vector<2x128xf32>
    %433 = vector.extract_strided_slice %432 {offsets = [0, 0], sizes = [2, 32], strides = [1, 1]} : vector<2x128xf32> to vector<2x32xf32>
    %cst_131 = arith.constant 5.000000e-01 : f32
    %434 = vector.broadcast %cst_131 : f32 to vector<2x32xf32>
    %435 = arith.mulf %434, %433 : vector<2x32xf32>
    %cst_132 = arith.constant 5.000000e-01 : f32
    %436 = vector.broadcast %cst_132 : f32 to vector<2x32xf32>
    %437 = arith.addf %435, %436 : vector<2x32xf32>
    %438 = vector.extract_strided_slice %432 {offsets = [0, 32], sizes = [2, 32], strides = [1, 1]} : vector<2x128xf32> to vector<2x32xf32>
    %cst_133 = arith.constant 5.000000e-01 : f32
    %439 = vector.broadcast %cst_133 : f32 to vector<2x32xf32>
    %440 = arith.mulf %439, %438 : vector<2x32xf32>
    %cst_134 = arith.constant 5.000000e-01 : f32
    %441 = vector.broadcast %cst_134 : f32 to vector<2x32xf32>
    %442 = arith.addf %440, %441 : vector<2x32xf32>
    %443 = vector.extract_strided_slice %432 {offsets = [0, 64], sizes = [2, 32], strides = [1, 1]} : vector<2x128xf32> to vector<2x32xf32>
    %444 = vector.extract_strided_slice %432 {offsets = [0, 96], sizes = [2, 32], strides = [1, 1]} : vector<2x128xf32> to vector<2x32xf32>
    %cst_135 = arith.constant 5.000000e-01 : f32
    %445 = vector.broadcast %cst_135 : f32 to vector<2x32xf32>
    %446 = arith.mulf %445, %444 : vector<2x32xf32>
    %cst_136 = arith.constant 5.000000e-01 : f32
    %447 = vector.broadcast %cst_136 : f32 to vector<2x32xf32>
    %448 = arith.addf %446, %447 : vector<2x32xf32>
    %449 = arith.mulf %442, %422 : vector<2x32xf32>
    %450 = arith.mulf %437, %443 : vector<2x32xf32>
    %451 = arith.addf %449, %450 : vector<2x32xf32>
    %452 = math.tanh %451 : vector<2x32xf32>
    %453 = arith.mulf %448, %452 : vector<2x32xf32>
    %454 = tpu.concatenate %216, %453 in 0 : vector<2x32xf32>, vector<2x32xf32> -> vector<4x32xf32>
    %cst_137 = arith.constant 0.000000e+00 : f32
    %455 = vector.broadcast %cst_137 : f32 to vector<4x32xf32>
    %456 = arith.maximumf %454, %455 : vector<4x32xf32>
    %c0_138 = arith.constant 0 : index
    %c0_139 = arith.constant 0 : index
    %457 = vector.load %arg7[%c0_138, %c0_139] : memref<32x1xf32, #tpu.memory_space<vmem>>, vector<32x1xf32>
    %cst_140 = arith.constant dense<0.000000e+00> : vector<4x1xf32>
    %458 = tpu.matmul %456, %457, %cst_140 {dimension_numbers = #tpu.dot_dimension_numbers<[1], [0], [0], [1], [0, 0, 1, 1], [], []>} : vector<4x32xf32>, vector<32x1xf32>, vector<4x1xf32> -> vector<4x1xf32>
    %c0_141 = arith.constant 0 : index
    %c0_142 = arith.constant 0 : index
    %459 = vector.load %arg8[%c0_141, %c0_142] : memref<1x1xf32, #tpu.memory_space<vmem>>, vector<1x1xf32>
    %460 = vector.broadcast %459 : vector<1x1xf32> to vector<4x1xf32>
    %461 = arith.addf %458, %460 : vector<4x1xf32>
    %c0_143 = arith.constant 0 : index
    %c0_144 = arith.constant 0 : index
    %462 = vector.load %arg9[%c0_143, %c0_144] : memref<4x1xf32, #tpu.memory_space<vmem>>, vector<4x1xf32>
    tpu.vector_store %arg9[%c0_143, %c0_144], %461 {strides = array<i32>} : memref<4x1xf32, #tpu.memory_space<vmem>>, vector<4x1xf32>,
    return
  }
}

</mosaic_0001>

<bundles_post_ra>
// kernel: lstm_forward.1
= control target key start
LH: loop header
LB: loop body
LE: loop exit
PB: predicated region body
PF: predicated region fallthrough
CT: control target
= control target key end

     0   :  { %vm56_vm0 = vcmask 1043456   ;;  %v2182_v0 = vmov 0.0   ;;  %vm49_vm1 = vcmask 31744   ;;  %vm2183_vm2 = vmmov 0   ;;  %s2602_s2 = inlined_call_operand.vmem [shape: bf16[32,128], index: 2, kind: input, shape index: {}]   ;;  %s2603_s1 = inlined_call_operand.vmem [shape: f32[4,128], index: 1, kind: input, shape index: {}]   ;;  %s2604_s0 = inlined_call_operand.vmem [shape: f32[16,4], index: 0, kind: input, shape index: {}]   ;;  %s2605_s3 = inlined_call_operand.vmem [shape: f32[1,128], index: 3, kind: input, shape index: {}]   ;;  %s2606_s4 = inlined_call_operand.vmem [shape: bf16[32,128], index: 4, kind: input, shape index: {}]   ;;  %s2607_s5 = inlined_call_operand.vmem [shape: bf16[32,128], index: 5, kind: input, shape index: {}]   ;;  %s2608_s6 = inlined_call_operand.vmem [shape: f32[1,128], index: 6, kind: input, shape index: {}]   ;;  %s2609_s7 = inlined_call_operand.vmem [shape: f32[32,1], index: 7, kind: input, shape index: {}]   ;;  %s2610_s8 = inlined_call_operand.<no memory space> [shape: f32[1,1], index: 8, kind: input, shape index: {}]   ;;  %s2611_s9 = inlined_call_operand.vmem [shape: f32[4,1], index: 9, kind: output, shape index: {}]  }
   0x1   :  { %1857 = vmatprep.subr.bf16.mxu1 %v2182_v0  ;;  %v2242_v1 = vld [vmem:[%s2602_s2] sm:$0xff]   ;;  %1861 = vmatprep.mubr.msk.bf16.mxu1 %vm2183_vm2, %v2182_v0  ;;  %v40_v4 = vld [vmem:[%s2604_s0 + $0x8] sm:$0xff]  ;;  %v2184_v6 = vmov 0   ;;  %vm147_vm3 = vcmask 261120   ;;  %vm1642_vm4 = vcmask 1041408   ;;  %vm1731_vm5 = vcmask 3072  }
   0x2   :  { %v41_v2 = vld [vmem:[%s2603_s1] sm:$0xf]  ;;  %1858 = vmatpush3.bf16.msra.mxu1 %v2242_v1  ;;  %v2259_v5 = vld [vmem:[%s2602_s2 + $0x8] sm:$0xff]   ;;  %s2185_s2 = smov 64  }
   0x3   :  { %v39_v3 = vld [vmem:[%s2604_s0] sm:$0xff]  ;;  %1852 = vmatprep.subr.msk.mxu0 %vm56_vm0, %v41_v2  ;;  %1859 = vmatprep.subr.bf16.mxu1 %v2182_v0 }
   0x4   :  { %1853 = vmatpush3.msk.msra.mxu0 %vm56_vm0, %v41_v2  ;;  %1854 = vmatprep.mubr.msk.f32.mxu0 %vm49_vm1, %v39_v3  ;;  %v1737_v7 = vld [vmem:[%s2605_s3] ss:$0 sm:$0xff]  ;;  %s2186_s3 = smov 32  }
   0x5   :  { %1855 = vmatmul.mubr.msk.f32.vlgmr.msra.gmra.mrb[0].mxu0 %vm49_vm1, %v40_v4  ;;  %1865 = vmatprep.subr.bf16.mxu0 %v2182_v0 }
   0x6   :  { %1869 = vmatprep.mubr.msk.bf16.mxu0 %vm2183_vm2, %v2182_v0  ;;  %1860 = vmatpush3.bf16.msra.mxu1 %v2259_v5 }
   0x7   :  { %1866 = vmatpush3.bf16.msra.mxu0 %v2242_v1  ;;  %1873 = vmatprep.subr.bf16.mxu1 %v2182_v0 }
   0x8   :  { %1867 = vmatprep.subr.bf16.mxu0 %v2182_v0 }
   0x9   :  { %1862 = vmatmul.mubr.bf16.vlgmr.msra.gmra.mrb[0].mxu1 %v2184_v6 }
   0xa   :  { %1874 = vmatpush3.bf16.msra.mxu1 %v2242_v1  ;;  %1877 = vmatprep.mubr.msk.bf16.mxu1 %vm2183_vm2, %v2182_v0 }
   0xb   :  { %1868 = vmatpush3.bf16.msra.mxu0 %v2259_v5  ;;  %1875 = vmatprep.subr.bf16.mxu1 %v2182_v0 }
   0xc   :  { %1881 = vmatprep.subr.bf16.mxu0 %v2182_v0 }
   0xe   :  { %1876 = vmatpush3.bf16.msra.mxu1 %v2259_v5 }
   0xf   :  { %1889 = vmatprep.subr.bf16.mxu1 %v2182_v0 }
  0xd8   :  { %v1856_v8 = vpop.f32.mrb[0].mxu0 }
  0xd9   :  { %v2281_v9 = vadd.f32 %v1856_v8, %v1737_v7  ;;  %v126_v10 = vpop.f32.mrb[1].mxu0 }
  0xda   :  { %v2283_v11 = vadd.f32 %v1737_v7, %v126_v10 }
  0xdc   :  { %v185_v12 = vpop.f32.mrb[0].mxu1 }
  0xdd   :  { %v191_v13 = vadd.f32 %v185_v12, %v2283_v11  ;;  %v1863_v14 = vpop.f32.mrb[1].mxu1 }
  0xde   :  { %v188_v15 = vpop.f32.mrb[2].mxu1 }
  0xdf   :  { %2118 = vtanh.f32 %v191_v13  ;;  %v1864_v16 = vpop.f32.mrb[3].mxu1 }
  0xe9   :  { %v2119_v17 = vpop.eup %2118 }
  0xea   :  { %197 = vrot.lane.b32.xlu0 %v2119_v17, %s2185_s2  ;;  %v193_v18 = vmul.f32 0.5, %v2119_v17 }
  0xec   :  { %v194_v19 = vadd.f32 0.5, %v193_v18 }
  0xee   :  { %v195_v22 = vmul.f32 0.0, %v194_v19 }
 0x15c   :  { %v198_v20 = vpop.permute.xlu0 %197 }
 0x15d   :  { %v200_v21 = vmul.f32 %v198_v20, %v194_v19 }
 0x15f   :  { %202 = vrot.lane.b32.xlu0 %v200_v21, %s2186_s3 }
 0x1d1   :  { %v203_v23 = vpop.permute.xlu0 %202 }
 0x1d2   :  { %v205_v24 = vadd.f32 %v203_v23, %v195_v22 }
 0x1d4   :  { %2120 = vtanh.f32 %v205_v24  ;;  %v267_v41 = vrot.slane %v205_v24, 6 }
 0x1de   :  { %v2121_v25 = vpop.eup %2120 }
 0x1df   :  { %208 = vrot.lane.b32.xlu1 %v2121_v25, %s2185_s2 }
 0x251   :  { %v209_v26 = vpop.permute.xlu1 %208 }
 0x252   :  { %v211_v27 = vmul.f32 %v209_v26, %v194_v19 }
 0x254   :  { %v212_v28 = vpack.c.bf16 %v211_v27, %v211_v27 }
 0x256   :  { %214 = vrot.lane.b32.xlu1 %v212_v28, %s2186_s3 }
 0x2c8   :  { %v2290_v29 = vpop.permute.xlu1 %214 }
 0x2c9   :  { %1870 = vmatmul.mubr.msk.bf16.vlgmr.msra.gmra.mrb[4].mxu0 %vm147_vm3, %v2290_v29 }
 0x2ca   :  { %1882 = vmatpush3.bf16.msra.mxu0 %v2242_v1  ;;  %1885 = vmatprep.mubr.msk.bf16.mxu0 %vm2183_vm2, %v2182_v0 }
 0x2cb   :  { %1883 = vmatprep.subr.bf16.mxu0 %v2182_v0 }
 0x2ce   :  { %1884 = vmatpush3.bf16.msra.mxu0 %v2259_v5 }
 0x2cf   :  { %1897 = vmatprep.subr.bf16.mxu0 %v2182_v0 }
 0x39c   :  { %v253_v30 = vpop.f32.mrb[4].mxu0 }
 0x39d   :  { %v260_v31 = vrot.slane %v253_v30, 6  ;;  %v1871_v32 = vpop.f32.mrb[5].mxu0 }
 0x39e   :  { %v256_v33 = vpop.f32.mrb[6].mxu0 }
 0x39f   :  { %v262_v34 = vadd.f32 %v260_v31, %v2283_v11  ;;  %v1872_v35 = vpop.f32.mrb[7].mxu0 }
 0x3a1   :  { %2122 = vtanh.f32 %v262_v34 }
 0x3ab   :  { %v2123_v36 = vpop.eup %2122 }
 0x3ac   :  { %271 = vrot.lane.b32.xlu0 %v2123_v36, %s2185_s2  ;;  %v264_v37 = vmul.f32 0.5, %v2123_v36 }
 0x3ae   :  { %v265_v38 = vadd.f32 0.5, %v264_v37 }
 0x3b0   :  { %v269_v42 = vmul.f32 %v267_v41, %v265_v38 }
 0x41e   :  { %v272_v39 = vpop.permute.xlu0 %271 }
 0x41f   :  { %v274_v40 = vmul.f32 %v272_v39, %v265_v38 }
 0x421   :  { %276 = vrot.lane.b32.xlu1 %v274_v40, %s2186_s3 }
 0x493   :  { %v277_v43 = vpop.permute.xlu1 %276 }
 0x494   :  { %v279_v44 = vadd.f32 %v277_v43, %v269_v42 }
 0x496   :  { %2124 = vtanh.f32 %v279_v44  ;;  %v342_v62 = vrot.slane %v279_v44, 6 }
 0x4a0   :  { %v2125_v45 = vpop.eup %2124 }
 0x4a1   :  { %282 = vrot.lane.b32.xlu0 %v2125_v45, %s2185_s2 }
 0x513   :  { %v283_v46 = vpop.permute.xlu0 %282 }
 0x514   :  { %v285_v47 = vmul.f32 %v283_v46, %v265_v38 }
 0x516   :  { %v286_v48 = vpack.c.bf16 %v285_v47, %v285_v47 }
 0x518   :  { %v288_v49 = vrot.slane %v286_v48, 1 }
 0x51a   :  { %289 = vrot.lane.b32.xlu1 %v288_v49, %s2186_s3 }
 0x58c   :  { %v2305_v50 = vpop.permute.xlu1 %289 }
 0x58d   :  { %1878 = vmatmul.mubr.msk.bf16.vlgmr.msra.gmra.mrb[4].mxu1 %vm147_vm3, %v2305_v50 }
 0x58e   :  { %1890 = vmatpush3.bf16.msra.mxu1 %v2242_v1  ;;  %1893 = vmatprep.mubr.msk.bf16.mxu1 %vm2183_vm2, %v2182_v0 }
 0x58f   :  { %1891 = vmatprep.subr.bf16.mxu1 %v2182_v0 }
 0x592   :  { %1892 = vmatpush3.bf16.msra.mxu1 %v2259_v5 }
 0x593   :  { %1905 = vmatprep.subr.bf16.mxu1 %v2182_v0 }
 0x660   :  { %v328_v51 = vpop.f32.mrb[4].mxu1 }
 0x661   :  { %v335_v52 = vrot.slane %v328_v51, 4  ;;  %v1879_v53 = vpop.f32.mrb[5].mxu1 }
 0x662   :  { %v331_v54 = vpop.f32.mrb[6].mxu1 }
 0x663   :  { %v337_v55 = vadd.f32 %v335_v52, %v2283_v11  ;;  %v1880_v56 = vpop.f32.mrb[7].mxu1 }
 0x665   :  { %2126 = vtanh.f32 %v337_v55 }
 0x66f   :  { %v2127_v57 = vpop.eup %2126 }
 0x670   :  { %346 = vrot.lane.b32.xlu0 %v2127_v57, %s2185_s2  ;;  %v339_v58 = vmul.f32 0.5, %v2127_v57 }
 0x672   :  { %v340_v59 = vadd.f32 0.5, %v339_v58 }
 0x674   :  { %v344_v63 = vmul.f32 %v342_v62, %v340_v59 }
 0x6e2   :  { %v347_v60 = vpop.permute.xlu0 %346 }
 0x6e3   :  { %v349_v61 = vmul.f32 %v347_v60, %v340_v59 }
 0x6e5   :  { %351 = vrot.lane.b32.xlu1 %v349_v61, %s2186_s3 }
 0x757   :  { %v352_v2 = vpop.permute.xlu1 %351 }
 0x758   :  { %v354_v3 = vadd.f32 %v352_v2, %v344_v63 }
 0x75a   :  { %2128 = vtanh.f32 %v354_v3  ;;  %v417_v25 = vrot.slane %v354_v3, 6 }
 0x764   :  { %v2129_v4 = vpop.eup %2128 }
 0x765   :  { %357 = vrot.lane.b32.xlu0 %v2129_v4, %s2185_s2 }
 0x7d7   :  { %v358_v7 = vpop.permute.xlu0 %357 }
 0x7d8   :  { %v360_v8 = vmul.f32 %v358_v7, %v340_v59 }
 0x7da   :  { %v361_v10 = vpack.c.bf16 %v360_v8, %v360_v8 }
 0x7dc   :  { %v363_v12 = vrot.slane %v361_v10, 2 }
 0x7de   :  { %364 = vrot.lane.b32.xlu1 %v363_v12, %s2186_s3 }
 0x850   :  { %v2320_v13 = vpop.permute.xlu1 %364 }
 0x851   :  { %1886 = vmatmul.mubr.msk.bf16.vlgmr.msra.gmra.mrb[8].mxu0 %vm147_vm3, %v2320_v13 }
 0x852   :  { %1898 = vmatpush3.bf16.msra.mxu0 %v2242_v1  ;;  %1901 = vmatprep.mubr.msk.bf16.mxu0 %vm2183_vm2, %v2182_v0 }
 0x853   :  { %1899 = vmatprep.subr.bf16.mxu0 %v2182_v0 }
 0x856   :  { %1900 = vmatpush3.bf16.msra.mxu0 %v2259_v5 }
 0x857   :  { %1913 = vmatprep.subr.bf16.mxu0 %v2182_v0 }
 0x924   :  { %v403_v14 = vpop.f32.mrb[8].mxu0 }
 0x925   :  { %v410_v15 = vrot.slane %v403_v14, 2  ;;  %v1887_v16 = vpop.f32.mrb[9].mxu0 }
 0x926   :  { %v406_v17 = vpop.f32.mrb[10].mxu0  ;;  %v2371_v16 = vld [vmem:[%s2606_s4] sm:$0xff]  }
 0x927   :  { %v412_v18 = vadd.f32 %v410_v15, %v2283_v11  ;;  %v1888_v19 = vpop.f32.mrb[11].mxu0 }
 0x928   :  { %v2390_v19 = vld [vmem:[%s2607_s5] sm:$0xff]  }
 0x929   :  { %2130 = vtanh.f32 %v412_v18  ;;  %v2381_v18 = vld [vmem:[%s2606_s4 + $0x8] sm:$0xff]  }
 0x933   :  { %v2131_v20 = vpop.eup %2130 }
 0x934   :  { %421 = vrot.lane.b32.xlu0 %v2131_v20, %s2185_s2  ;;  %v414_v21 = vmul.f32 0.5, %v2131_v20  ;;  %v2399_v20 = vld [vmem:[%s2607_s5 + $0x8] sm:$0xff]  }
 0x936   :  { %v415_v22 = vadd.f32 0.5, %v414_v21 }
 0x938   :  { %v419_v26 = vmul.f32 %v417_v25, %v415_v22  ;;  %v2426_v25 = vld [vmem:[%s2608_s6] ss:$0 sm:$0xff] }
 0x9a6   :  { %v422_v23 = vpop.permute.xlu0 %421 }
 0x9a7   :  { %v424_v24 = vmul.f32 %v422_v23, %v415_v22 }
 0x9a9   :  { %426 = vrot.lane.b32.xlu1 %v424_v24, %s2186_s3 }
 0xa1b   :  { %v427_v27 = vpop.permute.xlu1 %426 }
 0xa1c   :  { %v429_v28 = vadd.f32 %v427_v27, %v419_v26 }
 0xa1e   :  { %2132 = vtanh.f32 %v429_v28  ;;  %v489_v45 = vrot.slane %v429_v28, 6 }
 0xa28   :  { %v2133_v30 = vpop.eup %2132 }
 0xa29   :  { %432 = vrot.lane.b32.xlu0 %v2133_v30, %s2185_s2 }
 0xa9b   :  { %v433_v11 = vpop.permute.xlu0 %432 }
 0xa9c   :  { %v435_v31 = vmul.f32 %v433_v11, %v415_v22 }
 0xa9e   :  { %v436_v32 = vpack.c.bf16 %v435_v31, %v435_v31 }
 0xaa0   :  { %v438_v33 = vrot.slane %v436_v32, 3 }
 0xaa2   :  { %439 = vrot.lane.b32.xlu1 %v438_v33, %s2186_s3 }
 0xb14   :  { %v2335_v34 = vpop.permute.xlu1 %439 }
 0xb15   :  { %1894 = vmatmul.mubr.msk.bf16.vlgmr.msra.gmra.mrb[8].mxu1 %vm147_vm3, %v2335_v34 }
 0xb16   :  { %1906 = vmatpush3.bf16.msra.mxu1 %v2242_v1  ;;  %1909 = vmatprep.mubr.msk.bf16.mxu1 %vm2183_vm2, %v2182_v0 }
 0xb17   :  { %1907 = vmatprep.subr.bf16.mxu1 %v2182_v0 }
 0xb1a   :  { %1908 = vmatpush3.bf16.msra.mxu1 %v2259_v5 }
 0xb1b   :  { %1921 = vmatprep.subr.bf16.mxu1 %v2182_v0 }
 0xbe8   :  { %v478_v35 = vpop.f32.mrb[8].mxu1 }
 0xbe9   :  { %v484_v36 = vadd.f32 %v478_v35, %v2281_v9  ;;  %v1895_v37 = vpop.f32.mrb[9].mxu1 }
 0xbea   :  { %v481_v38 = vpop.f32.mrb[10].mxu1 }
 0xbeb   :  { %2134 = vtanh.f32 %v484_v36  ;;  %v1896_v39 = vpop.f32.mrb[11].mxu1 }
 0xbf5   :  { %v2135_v40 = vpop.eup %2134 }
 0xbf6   :  { %493 = vrot.lane.b32.xlu0 %v2135_v40, %s2185_s2  ;;  %v486_v41 = vmul.f32 0.5, %v2135_v40 }
 0xbf8   :  { %v487_v42 = vadd.f32 0.5, %v486_v41 }
 0xbfa   :  { %v491_v46 = vmul.f32 %v489_v45, %v487_v42 }
 0xc68   :  { %v494_v43 = vpop.permute.xlu0 %493 }
 0xc69   :  { %v496_v44 = vmul.f32 %v494_v43, %v487_v42 }
 0xc6b   :  { %498 = vrot.lane.b32.xlu1 %v496_v44, %s2186_s3 }
 0xcdd   :  { %v499_v47 = vpop.permute.xlu1 %498 }
 0xcde   :  { %v501_v48 = vadd.f32 %v499_v47, %v491_v46 }
 0xce0   :  { %2136 = vtanh.f32 %v501_v48 }
 0xcea   :  { %v2137_v49 = vpop.eup %2136 }
 0xceb   :  { %504 = vrot.lane.b32.xlu0 %v2137_v49, %s2185_s2 }
 0xd5d   :  { %v505_v51 = vpop.permute.xlu0 %504 }
 0xd5e   :  { %v507_v52 = vmul.f32 %v505_v51, %v487_v42 }
 0xd60   :  { %v508_v53 = vpack.c.bf16 %v507_v52, %v507_v52 }
 0xd62   :  { %510 = vrot.lane.b32.xlu1 %v508_v53, %s2186_s3 }
 0xdd4   :  { %v2350_v54 = vpop.permute.xlu1 %510 }
 0xdd5   :  { %1902 = vmatmul.mubr.msk.bf16.vlgmr.msra.gmra.mrb[12].mxu0 %vm147_vm3, %v2350_v54 }
 0xdd6   :  { %1914 = vmatpush3.bf16.msra.mxu0 %v2242_v1  ;;  %1917 = vmatprep.mubr.msk.bf16.mxu0 %vm2183_vm2, %v2182_v0 }
 0xdd7   :  { %1915 = vmatprep.subr.bf16.mxu0 %v2182_v0 }
 0xdda   :  { %1916 = vmatpush3.bf16.msra.mxu0 %v2259_v5  ;;  %v563_v5 = vrot.slane %v501_v48, 6 }
 0xddb   :  { %1937 = vmatprep.subr.bf16.mxu0 %v2182_v0 }
 0xea8   :  { %v549_v55 = vpop.f32.mrb[12].mxu0 }
 0xea9   :  { %v556_v56 = vrot.slane %v549_v55, 6  ;;  %v1903_v57 = vpop.f32.mrb[13].mxu0 }
 0xeaa   :  { %v552_v58 = vpop.f32.mrb[14].mxu0 }
 0xeab   :  { %v558_v59 = vadd.f32 %v556_v56, %v2281_v9  ;;  %v1904_v60 = vpop.f32.mrb[15].mxu0 }
 0xead   :  { %2138 = vtanh.f32 %v558_v59 }
 0xeb7   :  { %v2139_v61 = vpop.eup %2138 }
 0xeb8   :  { %567 = vrot.lane.b32.xlu0 %v2139_v61, %s2185_s2  ;;  %v560_v1 = vmul.f32 0.5, %v2139_v61 }
 0xeba   :  { %v561_v62 = vadd.f32 0.5, %v560_v1 }
 0xebc   :  { %v565_v3 = vmul.f32 %v563_v5, %v561_v62 }
 0xf2a   :  { %v568_v63 = vpop.permute.xlu0 %567 }
 0xf2b   :  { %v570_v2 = vmul.f32 %v568_v63, %v561_v62 }
 0xf2d   :  { %572 = vrot.lane.b32.xlu1 %v570_v2, %s2186_s3 }
 0xf9f   :  { %v573_v4 = vpop.permute.xlu1 %572 }
 0xfa0   :  { %v2363_v7 = vadd.f32 %v573_v4, %v565_v3 }
 0xfa2   :  { %2140 = vtanh.f32 %v2363_v7  ;;  %v638_v41 = vrot.slane %v2363_v7, 6 }
 0xfac   :  { %v2141_v8 = vpop.eup %2140 }
 0xfad   :  { %578 = vrot.lane.b32.xlu0 %v2141_v8, %s2185_s2 }
0x101f   :  { %v579_v10 = vpop.permute.xlu0 %578 }
0x1020   :  { %v581_v12 = vmul.f32 %v579_v10, %v561_v62 }
0x1022   :  { %v582_v14 = vpack.c.bf16 %v581_v12, %v581_v12 }
0x1024   :  { %v584_v15 = vrot.slane %v582_v14, 1 }
0x1026   :  { %585 = vrot.lane.b32.xlu1 %v584_v15, %s2186_s3 }
0x1098   :  { %v2373_v17 = vpop.permute.xlu1 %585 }
0x1099   :  { %1910 = vmatmul.mubr.msk.bf16.vlgmr.msra.gmra.mrb[12].mxu1 %vm147_vm3, %v2373_v17 }
0x109a   :  { %1922 = vmatpush3.bf16.msra.mxu1 %v2371_v16  ;;  %1925 = vmatprep.mubr.msk.bf16.mxu1 %vm2183_vm2, %v2182_v0 }
0x109b   :  { %1923 = vmatprep.subr.bf16.mxu1 %v2182_v0 }
0x109e   :  { %1924 = vmatpush3.bf16.msra.mxu1 %v2381_v18 }
0x109f   :  { %1929 = vmatprep.subr.bf16.mxu1 %v2182_v0 }
0x10a1   :  { %1926 = vmatmul.mubr.msk.bf16.vlgmr.msra.gmra.mrb[16].mxu1 %vm147_vm3, %v2290_v29 }
0x10a2   :  { %1930 = vmatpush3.bf16.msra.mxu1 %v2390_v19  ;;  %1933 = vmatprep.mubr.msk.bf16.mxu1 %vm2183_vm2, %v2182_v0 }
0x10a3   :  { %1931 = vmatprep.subr.bf16.mxu1 %v2182_v0 }
0x10a6   :  { %1932 = vmatpush3.bf16.msra.mxu1 %v2399_v20 }
0x10a7   :  { %1953 = vmatprep.subr.bf16.mxu1 %v2182_v0 }
0x10ad   :  { %1934 = vmatmul.mubr.bf16.vlgmr.msra.gmra.mrb[16].mxu1 %v2184_v6 }
0x10ae   :  { %1954 = vmatpush3.bf16.msra.mxu1 %v2371_v16  ;;  %1957 = vmatprep.mubr.msk.bf16.mxu1 %vm2183_vm2, %v2182_v0 }
0x10af   :  { %1955 = vmatprep.subr.bf16.mxu1 %v2182_v0 }
0x10b2   :  { %1956 = vmatpush3.bf16.msra.mxu1 %v2381_v18 }
0x10b3   :  { %1961 = vmatprep.subr.bf16.mxu1 %v2182_v0 }
0x10b5   :  { %1958 = vmatmul.mubr.msk.bf16.vlgmr.msra.gmra.mrb[20].mxu1 %vm147_vm3, %v2320_v13 }
0x10b6   :  { %1962 = vmatpush3.bf16.msra.mxu1 %v2390_v19  ;;  %1965 = vmatprep.mubr.msk.bf16.mxu1 %vm2183_vm2, %v2182_v0 }
0x10b7   :  { %1963 = vmatprep.subr.bf16.mxu1 %v2182_v0 }
0x10ba   :  { %1964 = vmatpush3.bf16.msra.mxu1 %v2399_v20 }
0x10bb   :  { %1985 = vmatprep.subr.bf16.mxu1 %v2182_v0 }
0x116c   :  { %v624_v6 = vpop.f32.mrb[12].mxu1 }
0x116d   :  { %v631_v29 = vrot.slane %v624_v6, 4  ;;  %v1911_v21 = vpop.f32.mrb[13].mxu1 }
0x116e   :  { %v627_v22 = vpop.f32.mrb[14].mxu1 }
0x116f   :  { %v633_v23 = vadd.f32 %v631_v29, %v2281_v9  ;;  %v1912_v24 = vpop.f32.mrb[15].mxu1 }
0x1171   :  { %2142 = vtanh.f32 %v633_v23 }
0x117b   :  { %v2143_v13 = vpop.eup %2142 }
0x117c   :  { %642 = vrot.lane.b32.xlu0 %v2143_v13, %s2185_s2  ;;  %v635_v32 = vmul.f32 0.5, %v2143_v13 }
0x117e   :  { %v636_v33 = vadd.f32 0.5, %v635_v32 }
0x1180   :  { %v845_v26 = vpop.f32.mrb[16].mxu1  ;;  %v640_v42 = vmul.f32 %v638_v41, %v636_v33 }
0x1181   :  { %v2066_v27 = vadd.f32 %v2426_v25, %v845_v26  ;;  %v1935_v28 = vpop.f32.mrb[17].mxu1 }
0x1182   :  { %v848_v30 = vpop.f32.mrb[18].mxu1 }
0x1183   :  { %2144 = vtanh.f32 %v2066_v27  ;;  %v1936_v11 = vpop.f32.mrb[19].mxu1 }
0x118d   :  { %v2145_v31 = vpop.eup %2144 }
0x118e   :  { %857 = vrot.lane.b32.xlu1 %v2145_v31, %s2185_s2  ;;  %v853_v37 = vmul.f32 0.5, %v2145_v31 }
0x1190   :  { %v854_v38 = vadd.f32 0.5, %v853_v37 }
0x1192   :  { %v855_v46 = vmul.f32 0.0, %v854_v38 }
0x11ee   :  { %v643_v35 = vpop.permute.xlu0 %642 }
0x11ef   :  { %v645_v36 = vmul.f32 %v643_v35, %v636_v33 }
0x11f1   :  { %647 = vrot.lane.b32.xlu0 %v645_v36, %s2186_s3 }
0x1200   :  { %v858_v39 = vpop.permute.xlu1 %857 }
0x1201   :  { %v860_v40 = vmul.f32 %v858_v39, %v854_v38 }
0x1203   :  { %862 = vrot.lane.b32.xlu1 %v860_v40, %s2186_s3 }
0x1263   :  { %v648_v43 = vpop.permute.xlu0 %647 }
0x1264   :  { %v2433_v44 = vadd.f32 %v648_v43, %v640_v42 }
0x1266   :  { %2146 = vtanh.f32 %v2433_v44 }
0x1270   :  { %v2147_v45 = vpop.eup %2146 }
0x1271   :  { %653 = vrot.lane.b32.xlu0 %v2147_v45, %s2185_s2 }
0x1275   :  { %v863_v47 = vpop.permute.xlu1 %862 }
0x1276   :  { %v865_v48 = vadd.f32 %v863_v47, %v855_v46 }
0x1278   :  { %2148 = vtanh.f32 %v865_v48 }
0x1282   :  { %v2149_v49 = vpop.eup %2148 }
0x1283   :  { %868 = vrot.lane.b32.xlu1 %v2149_v49, %s2185_s2 }
0x12e3   :  { %v654_v51 = vpop.permute.xlu0 %653 }
0x12e4   :  { %v656_v52 = vmul.f32 %v654_v51, %v636_v33 }
0x12e6   :  { %v657_v53 = vpack.c.bf16 %v656_v52, %v656_v52 }
0x12e8   :  { %v659_v55 = vrot.slane %v657_v53, 2 }
0x12ea   :  { %660 = vrot.lane.b32.xlu0 %v659_v55, %s2186_s3 }
0x12f5   :  { %v869_v56 = vpop.permute.xlu1 %868 }
0x12f6   :  { %v871_v57 = vmul.f32 %v869_v56, %v854_v38 }
0x12f8   :  { %v912_v58 = vpack.c.bf16 %v871_v57, %v871_v57 }
0x12fa   :  { %914 = vrot.lane.b32.xlu1 %v912_v58, %s2186_s3 }
0x135c   :  { %v2440_v59 = vpop.permute.xlu0 %660 }
0x135d   :  { %1918 = vmatmul.mubr.msk.bf16.vlgmr.msra.gmra.mrb[16].mxu0 %vm147_vm3, %v2440_v59 }
0x135e   :  { %1938 = vmatpush3.bf16.msra.mxu0 %v2371_v16  ;;  %1941 = vmatprep.mubr.msk.bf16.mxu0 %vm2183_vm2, %v2182_v0 }
0x135f   :  { %1939 = vmatprep.subr.bf16.mxu0 %v2182_v0 }
0x1362   :  { %1940 = vmatpush3.bf16.msra.mxu0 %v2381_v18 }
0x1363   :  { %1945 = vmatprep.subr.bf16.mxu0 %v2182_v0 }
0x1365   :  { %1942 = vmatmul.mubr.msk.bf16.vlgmr.msra.gmra.mrb[20].mxu0 %vm147_vm3, %v2305_v50 }
0x1366   :  { %1946 = vmatpush3.bf16.msra.mxu0 %v2390_v19  ;;  %1949 = vmatprep.mubr.msk.bf16.mxu0 %vm2183_vm2, %v2182_v0 }
0x1367   :  { %1947 = vmatprep.subr.bf16.mxu0 %v2182_v0 }
0x136a   :  { %1948 = vmatpush3.bf16.msra.mxu0 %v2399_v20 }
0x136b   :  { %1969 = vmatprep.subr.bf16.mxu0 %v2182_v0 }
0x136c   :  { %v915_v60 = vpop.permute.xlu1 %914 }
0x1371   :  { %1950 = vmatmul.mubr.msk.bf16.vlgmr.msra.gmra.mrb[20].mxu0 %vm147_vm3, %v915_v60 }
0x1372   :  { %1970 = vmatpush3.bf16.msra.mxu0 %v2371_v16  ;;  %1973 = vmatprep.mubr.msk.bf16.mxu0 %vm2183_vm2, %v2182_v0 }
0x1373   :  { %1971 = vmatprep.subr.bf16.mxu0 %v2182_v0 }
0x1376   :  { %1972 = vmatpush3.bf16.msra.mxu0 %v2381_v18 }
0x1377   :  { %1977 = vmatprep.subr.bf16.mxu0 %v2182_v0 }
0x1379   :  { %1974 = vmatmul.mubr.msk.bf16.vlgmr.msra.gmra.mrb[24].mxu0 %vm147_vm3, %v2335_v34 }
0x137a   :  { %1978 = vmatpush3.bf16.msra.mxu0 %v2390_v19  ;;  %1981 = vmatprep.mubr.msk.bf16.mxu0 %vm2183_vm2, %v2182_v0 }
0x137b   :  { %1979 = vmatprep.subr.bf16.mxu0 %v2182_v0 }
0x137e   :  { %1980 = vmatpush3.bf16.msra.mxu0 %v2399_v20 }
0x137f   :  { %2001 = vmatprep.subr.bf16.mxu0 %v2182_v0 }
0x1430   :  { %v2473_v50 = vpop.f32.mrb[16].mxu0 }
0x1431   :  { %v1919_v61 = vpop.f32.mrb[17].mxu0 }
0x1432   :  { %v702_v1 = vpop.f32.mrb[18].mxu0 }
0x1433   :  { %v1920_v62 = vpop.f32.mrb[19].mxu0 }
0x1444   :  { %v953_v63 = vpop.f32.mrb[20].mxu0 }
0x1445   :  { %v2067_v2 = vadd.f32 %v2426_v25, %v953_v63  ;;  %v1951_v34 = vpop.f32.mrb[21].mxu0 }
0x1446   :  { %v956_v5 = vpop.f32.mrb[22].mxu0 }
0x1447   :  { %2150 = vtanh.f32 %v2067_v2  ;;  %v1952_v3 = vpop.f32.mrb[23].mxu0 }
0x1451   :  { %v2151_v4 = vpop.eup %2150 }
0x1452   :  { %965 = vrot.lane.b32.xlu0 %v2151_v4, %s2185_s2  ;;  %v961_v7 = vmul.f32 0.5, %v2151_v4 }
0x1454   :  { %v962_v8 = vadd.f32 0.5, %v961_v7 }
0x1456   :  { %v963_v14 = vmul.f32 %v962_v8, %v865_v48 }
0x14c4   :  { %v966_v10 = vpop.permute.xlu0 %965 }
0x14c5   :  { %v968_v12 = vmul.f32 %v966_v10, %v962_v8 }
0x14c7   :  { %970 = vrot.lane.b32.xlu1 %v968_v12, %s2186_s3 }
0x1539   :  { %v971_v15 = vpop.permute.xlu1 %970 }
0x153a   :  { %v973_v6 = vadd.f32 %v971_v15, %v963_v14 }
0x153c   :  { %2152 = vtanh.f32 %v973_v6 }
0x1546   :  { %v2153_v29 = vpop.eup %2152 }
0x1547   :  { %976 = vrot.lane.b32.xlu0 %v2153_v29, %s2185_s2 }
0x15b9   :  { %v977_v21 = vpop.permute.xlu0 %976 }
0x15ba   :  { %v979_v22 = vmul.f32 %v977_v21, %v962_v8 }
0x15bc   :  { %v1020_v23 = vpack.c.bf16 %v979_v22, %v979_v22 }
0x15be   :  { %1022 = vrot.lane.b32.xlu1 %v1020_v23, %s2186_s3 }
0x1630   :  { %v1023_v24 = vpop.permute.xlu1 %1022 }
0x1631   :  { %1966 = vmatmul.mubr.msk.bf16.vlgmr.msra.gmra.mrb[20].mxu1 %vm147_vm3, %v1023_v24 }
0x1632   :  { %1986 = vmatpush3.bf16.msra.mxu1 %v2371_v16  ;;  %1989 = vmatprep.mubr.msk.bf16.mxu1 %vm2183_vm2, %v2182_v0 }
0x1633   :  { %1987 = vmatprep.subr.bf16.mxu1 %v2182_v0 }
0x1636   :  { %1988 = vmatpush3.bf16.msra.mxu1 %v2381_v18 }
0x1637   :  { %1993 = vmatprep.subr.bf16.mxu1 %v2182_v0 }
0x1639   :  { %1990 = vmatmul.mubr.msk.bf16.vlgmr.msra.gmra.mrb[24].mxu1 %vm147_vm3, %v2350_v54 }
0x163a   :  { %1994 = vmatpush3.bf16.msra.mxu1 %v2390_v19  ;;  %1997 = vmatprep.mubr.msk.bf16.mxu1 %vm2183_vm2, %v2182_v0 }
0x163b   :  { %1995 = vmatprep.subr.bf16.mxu1 %v2182_v0 }
0x163e   :  { %1996 = vmatpush3.bf16.msra.mxu1 %v2399_v20 }
0x163f   :  { %2017 = vmatprep.subr.bf16.mxu1 %v2182_v0 }
0x1704   :  { %v1061_v13 = vpop.f32.mrb[20].mxu1 }
0x1705   :  { %v2068_v26 = vadd.f32 %v2426_v25, %v1061_v13  ;;  %v1967_v27 = vpop.f32.mrb[21].mxu1 }
0x1706   :  { %v1064_v28 = vpop.f32.mrb[22].mxu1 }
0x1707   :  { %2154 = vtanh.f32 %v2068_v26  ;;  %v1968_v30 = vpop.f32.mrb[23].mxu1 }
0x1711   :  { %v2155_v11 = vpop.eup %2154 }
0x1712   :  { %1073 = vrot.lane.b32.xlu0 %v2155_v11, %s2185_s2  ;;  %v1069_v54 = vmul.f32 0.5, %v2155_v11 }
0x1714   :  { %v1070_v31 = vadd.f32 0.5, %v1069_v54 }
0x1716   :  { %v1071_v35 = vmul.f32 %v1070_v31, %v973_v6 }
0x1784   :  { %v1074_v32 = vpop.permute.xlu0 %1073 }
0x1785   :  { %v1076_v33 = vmul.f32 %v1074_v32, %v1070_v31 }
0x1787   :  { %1078 = vrot.lane.b32.xlu1 %v1076_v33, %s2186_s3 }
0x17f9   :  { %v1079_v36 = vpop.permute.xlu1 %1078 }
0x17fa   :  { %v1081_v37 = vadd.f32 %v1079_v36, %v1071_v35 }
0x17fc   :  { %2156 = vtanh.f32 %v1081_v37 }
0x1806   :  { %v2157_v38 = vpop.eup %2156 }
0x1807   :  { %1084 = vrot.lane.b32.xlu0 %v2157_v38, %s2185_s2 }
0x1879   :  { %v1085_v39 = vpop.permute.xlu0 %1084 }
0x187a   :  { %v1087_v40 = vmul.f32 %v1085_v39, %v1070_v31 }
0x187c   :  { %v1128_v41 = vpack.c.bf16 %v1087_v40, %v1087_v40 }
0x187e   :  { %1130 = vrot.lane.b32.xlu1 %v1128_v41, %s2186_s3 }
0x18f0   :  { %v1131_v42 = vpop.permute.xlu1 %1130 }
0x18f1   :  { %1982 = vmatmul.mubr.msk.bf16.vlgmr.msra.gmra.mrb[24].mxu0 %vm147_vm3, %v1131_v42 }
0x18f2   :  { %2002 = vmatpush3.bf16.msra.mxu0 %v2371_v16  ;;  %2005 = vmatprep.mubr.msk.bf16.mxu0 %vm2183_vm2, %v2182_v0 }
0x18f3   :  { %2003 = vmatprep.subr.bf16.mxu0 %v2182_v0 }
0x18f6   :  { %2004 = vmatpush3.bf16.msra.mxu0 %v2381_v18 }
0x18f7   :  { %2009 = vmatprep.subr.bf16.mxu0 %v2182_v0 }
0x18f9   :  { %2006 = vmatmul.mubr.msk.bf16.vlgmr.msra.gmra.mrb[28].mxu0 %vm147_vm3, %v2373_v17 }
0x18fa   :  { %2010 = vmatpush3.bf16.msra.mxu0 %v2390_v19  ;;  %2013 = vmatprep.mubr.msk.bf16.mxu0 %vm2183_vm2, %v2182_v0 }
0x18fb   :  { %2011 = vmatprep.subr.bf16.mxu0 %v2182_v0 }
0x18fe   :  { %2012 = vmatpush3.bf16.msra.mxu0 %v2399_v20 }
0x18ff   :  { %2033 = vmatprep.subr.bf16.mxu0 %v2182_v0 }
0x19c4   :  { %v1169_v43 = vpop.f32.mrb[24].mxu0 }
0x19c5   :  { %v2069_v45 = vadd.f32 %v2426_v25, %v1169_v43  ;;  %v1983_v46 = vpop.f32.mrb[25].mxu0 }
0x19c6   :  { %v1172_v47 = vpop.f32.mrb[26].mxu0 }
0x19c7   :  { %2158 = vtanh.f32 %v2069_v45  ;;  %v1984_v48 = vpop.f32.mrb[27].mxu0 }
0x19d1   :  { %v2159_v49 = vpop.eup %2158 }
0x19d2   :  { %1181 = vrot.lane.b32.xlu0 %v2159_v49, %s2185_s2  ;;  %v1177_v17 = vmul.f32 0.5, %v2159_v49 }
0x19d4   :  { %v1178_v51 = vadd.f32 0.5, %v1177_v17 }
0x19d6   :  { %v1179_v55 = vmul.f32 %v1178_v51, %v1081_v37 }
0x1a44   :  { %v1182_v52 = vpop.permute.xlu0 %1181 }
0x1a45   :  { %v1184_v53 = vmul.f32 %v1182_v52, %v1178_v51 }
0x1a47   :  { %1186 = vrot.lane.b32.xlu1 %v1184_v53, %s2186_s3 }
0x1ab9   :  { %v1187_v56 = vpop.permute.xlu1 %1186 }
0x1aba   :  { %v1189_v57 = vadd.f32 %v1187_v56, %v1179_v55 }
0x1abc   :  { %2160 = vtanh.f32 %v1189_v57 }
0x1ac6   :  { %v2161_v58 = vpop.eup %2160 }
0x1ac7   :  { %1192 = vrot.lane.b32.xlu0 %v2161_v58, %s2185_s2 }
0x1b39   :  { %v1193_v60 = vpop.permute.xlu0 %1192 }
0x1b3a   :  { %v1195_v61 = vmul.f32 %v1193_v60, %v1178_v51 }
0x1b3c   :  { %v1236_v1 = vpack.c.bf16 %v1195_v61, %v1195_v61 }
0x1b3e   :  { %1238 = vrot.lane.b32.xlu1 %v1236_v1, %s2186_s3 }
0x1bb0   :  { %v1239_v62 = vpop.permute.xlu1 %1238 }
0x1bb1   :  { %1998 = vmatmul.mubr.msk.bf16.vlgmr.msra.gmra.mrb[24].mxu1 %vm147_vm3, %v1239_v62 }
0x1bb2   :  { %2018 = vmatpush3.bf16.msra.mxu1 %v2371_v16  ;;  %2021 = vmatprep.mubr.msk.bf16.mxu1 %vm2183_vm2, %v2182_v0 }
0x1bb3   :  { %2019 = vmatprep.subr.bf16.mxu1 %v2182_v0 }
0x1bb6   :  { %2020 = vmatpush3.bf16.msra.mxu1 %v2381_v18 }
0x1bb7   :  { %2025 = vmatprep.subr.bf16.mxu1 %v2182_v0 }
0x1bb9   :  { %2022 = vmatmul.mubr.msk.bf16.vlgmr.msra.gmra.mrb[28].mxu1 %vm147_vm3, %v2440_v59 }
0x1bba   :  { %2026 = vmatpush3.bf16.msra.mxu1 %v2390_v19  ;;  %2029 = vmatprep.mubr.msk.bf16.mxu1 %vm2183_vm2, %v2182_v0 }
0x1bbb   :  { %2027 = vmatprep.subr.bf16.mxu1 %v2182_v0 }
0x1bbe   :  { %2028 = vmatpush3.bf16.msra.mxu1 %v2399_v20 }
0x1c84   :  { %v1277_v63 = vpop.f32.mrb[24].mxu1 }
0x1c85   :  { %v2070_v2 = vadd.f32 %v2426_v25, %v1277_v63  ;;  %v1999_v34 = vpop.f32.mrb[25].mxu1 }
0x1c86   :  { %v1280_v5 = vpop.f32.mrb[26].mxu1 }
0x1c87   :  { %2162 = vtanh.f32 %v2070_v2  ;;  %v2000_v3 = vpop.f32.mrb[27].mxu1 }
0x1c91   :  { %v2163_v4 = vpop.eup %2162 }
0x1c92   :  { %1289 = vrot.lane.b32.xlu0 %v2163_v4, %s2185_s2  ;;  %v1285_v59 = vmul.f32 0.5, %v2163_v4 }
0x1c94   :  { %v1286_v7 = vadd.f32 0.5, %v1285_v59 }
0x1c96   :  { %v1287_v12 = vmul.f32 %v1286_v7, %v1189_v57 }
0x1d04   :  { %v1290_v8 = vpop.permute.xlu0 %1289 }
0x1d05   :  { %v1292_v10 = vmul.f32 %v1290_v8, %v1286_v7 }
0x1d07   :  { %1294 = vrot.lane.b32.xlu1 %v1292_v10, %s2186_s3 }
0x1d79   :  { %v1295_v14 = vpop.permute.xlu1 %1294 }
0x1d7a   :  { %v1297_v15 = vadd.f32 %v1295_v14, %v1287_v12 }
0x1d7c   :  { %2164 = vtanh.f32 %v1297_v15 }
0x1d86   :  { %v2165_v6 = vpop.eup %2164 }
0x1d87   :  { %1300 = vrot.lane.b32.xlu0 %v2165_v6, %s2185_s2 }
0x1df9   :  { %v1301_v29 = vpop.permute.xlu0 %1300 }
0x1dfa   :  { %v1303_v21 = vmul.f32 %v1301_v29, %v1286_v7 }
0x1dfc   :  { %v1344_v22 = vpack.c.bf16 %v1303_v21, %v1303_v21 }
0x1dfe   :  { %1346 = vrot.lane.b32.xlu1 %v1344_v22, %s2186_s3 }
0x1e70   :  { %v1347_v23 = vpop.permute.xlu1 %1346 }
0x1e71   :  { %2014 = vmatmul.mubr.msk.bf16.vlgmr.msra.gmra.mrb[28].mxu0 %vm147_vm3, %v1347_v23 }
0x1e72   :  { %2034 = vmatpush3.bf16.msra.mxu0 %v2371_v16  ;;  %2037 = vmatprep.mubr.msk.bf16.mxu0 %vm2183_vm2, %v2182_v0 }
0x1e73   :  { %2035 = vmatprep.subr.bf16.mxu0 %v2182_v0 }
0x1e76   :  { %2036 = vmatpush3.bf16.msra.mxu0 %v2381_v18  ;;  %v706_v18 = vrot.slane %v2473_v50, 2 }
0x1e77   :  { %2041 = vmatprep.subr.bf16.mxu0 %v2182_v0 }
0x1e78   :  { %v708_v36 = vadd.f32 %v706_v18, %v2281_v9  ;;  %v713_v9 = vrot.slane %v2433_v44, 6  ;;  %v14_v18 = vstv %s2610_s8 }
0x1e79   :  { %15 = vst [vmem:[#allocation2] sm:$0x1] %v14_v18 }
0x1f44   :  { %v1385_v24 = vpop.f32.mrb[28].mxu0 }
0x1f45   :  { %v2071_v13 = vadd.f32 %v2426_v25, %v1385_v24  ;;  %v2015_v26 = vpop.f32.mrb[29].mxu0 }
0x1f46   :  { %v1388_v27 = vpop.f32.mrb[30].mxu0 }
0x1f47   :  { %2166 = vtanh.f32 %v2071_v13  ;;  %v2016_v28 = vpop.f32.mrb[31].mxu0  ;;  %v2187_v27 = vmov 0.0|0.0  }
0x1f48   :  { %2060 = vmatprep.subr.bf16.mxu1 %v2187_v27  ;;  %v1646_v28 = vld [vmem:[%s2609_s7 + $0x8] sm:$0xff] }
0x1f51   :  { %v2167_v30 = vpop.eup %2166 }
0x1f52   :  { %1397 = vrot.lane.b32.xlu0 %v2167_v30, %s2185_s2  ;;  %v1393_v16 = vmul.f32 0.5, %v2167_v30  ;;  %v1647_v30 = vld [vmem:[%s2609_s7 + $0x10] sm:$0xff] }
0x1f54   :  { %v1394_v11 = vadd.f32 0.5, %v1393_v16 }
0x1f56   :  { %v1395_v32 = vmul.f32 %v1394_v11, %v1297_v15 }
0x1fc4   :  { %v1398_v54 = vpop.permute.xlu0 %1397 }
0x1fc5   :  { %v1400_v31 = vmul.f32 %v1398_v54, %v1394_v11 }
0x1fc7   :  { %1402 = vrot.lane.b32.xlu1 %v1400_v31, %s2186_s3 }
0x2039   :  { %v1403_v33 = vpop.permute.xlu1 %1402 }
0x203a   :  { %v1405_v35 = vadd.f32 %v1403_v33, %v1395_v32 }
0x203c   :  { %2168 = vtanh.f32 %v1405_v35 }
0x203d   :  { %2170 = vtanh.f32 %v708_v36 }
0x2046   :  { %v2169_v37 = vpop.eup %2168 }
0x2047   :  { %1408 = vrot.lane.b32.xlu0 %v2169_v37, %s2185_s2  ;;  %v2171_v38 = vpop.eup %2170 }
0x2048   :  { %v710_v39 = vmul.f32 0.5, %v2171_v38 }
0x204a   :  { %v711_v43 = vadd.f32 0.5, %v710_v39 }
0x204b   :  { %717 = vrot.lane.b32.xlu0 %v2171_v38, %s2185_s2 }
0x204c   :  { %v715_v47 = vmul.f32 %v713_v9, %v711_v43 }
0x20b9   :  { %v1409_v40 = vpop.permute.xlu0 %1408 }
0x20ba   :  { %v1411_v41 = vmul.f32 %v1409_v40, %v1394_v11  ;;  %v1648_v11 = vld [vmem:[%s2609_s7 + $0x18] sm:$0xff]  ;;  %v1770_v40 = vld [vmem:[#allocation2] ss:$0 sm:$0xff] }
0x20bb   :  { %v2064_v54 = vpack.c.bf16 %v1648_v11, %v1647_v30 }
0x20bc   :  { %v1452_v42 = vpack.c.bf16 %v1411_v41, %v1411_v41 }
0x20bd   :  { %v718_v45 = vpop.permute.xlu0 %717 }
0x20be   :  { %v720_v50 = vmul.f32 %v718_v45, %v711_v43  ;;  %1454 = vrot.lane.b32.xlu1 %v1452_v42, %s2186_s3 }
0x20c0   :  { %722 = vrot.lane.b32.xlu0 %v720_v50, %s2186_s3 }
0x2130   :  { %v1455_v46 = vpop.permute.xlu1 %1454 }
0x2131   :  { %2030 = vmatmul.mubr.msk.bf16.vlgmr.msra.gmra.mrb[28].mxu1 %vm147_vm3, %v1455_v46 }
0x2132   :  { %v723_v48 = vpop.permute.xlu0 %722  ;;  %2057 = vmatprep.mubr.msk.f32.mxu1 %vm2183_vm2, %v2182_v0 }
0x2133   :  { %v725_v49 = vadd.f32 %v723_v48, %v715_v47 }
0x2135   :  { %2172 = vtanh.f32 %v725_v49 }
0x213f   :  { %v2173_v17 = vpop.eup %2172 }
0x2140   :  { %728 = vrot.lane.b32.xlu0 %v2173_v17, %s2185_s2 }
0x21b2   :  { %v729_v51 = vpop.permute.xlu0 %728 }
0x21b3   :  { %v2560_v52 = vmul.f32 %v729_v51, %v711_v43 }
0x21b5   :  { %v1520_v53 = vpack.c.bf16 %v2560_v52, %v2560_v52 }
0x21b7   :  { %v1522_v44 = vrot.slane %v1520_v53, 3 }
0x21b9   :  { %1523 = vrot.lane.b32.xlu0 %v1522_v44, %s2186_s3 }
0x2204   :  { %v1493_v55 = vpop.f32.mrb[28].mxu1 }
0x2205   :  { %v2072_v56 = vadd.f32 %v2426_v25, %v1493_v55  ;;  %v2031_v57 = vpop.f32.mrb[29].mxu1 }
0x2206   :  { %v1496_v58 = vpop.f32.mrb[30].mxu1 }
0x2207   :  { %2174 = vtanh.f32 %v2072_v56  ;;  %v2032_v60 = vpop.f32.mrb[31].mxu1 }
0x2211   :  { %v2175_v61 = vpop.eup %2174 }
0x2212   :  { %1505 = vrot.lane.b32.xlu1 %v2175_v61, %s2185_s2  ;;  %v1501_v62 = vmul.f32 0.5, %v2175_v61 }
0x2214   :  { %v1502_v63 = vadd.f32 0.5, %v1501_v62 }
0x2216   :  { %v1503_v5 = vmul.f32 %v1502_v63, %v1405_v35  ;;  %v1637_v35 = vrot.slane %v2560_v52, 6 }
0x222b   :  { %v1524_v1 = vpop.permute.xlu0 %1523 }
0x222c   :  { %2038 = vmatmul.mubr.msk.bf16.vlgmr.msra.gmra.mrb[32].mxu0 %vm147_vm3, %v1524_v1 }
0x222d   :  { %2042 = vmatpush3.bf16.msra.mxu0 %v2390_v19  ;;  %2045 = vmatprep.mubr.msk.bf16.mxu0 %vm2183_vm2, %v2182_v0 }
0x222e   :  { %2043 = vmatprep.subr.bf16.mxu0 %v2182_v0 }
0x2231   :  { %2044 = vmatpush3.bf16.msra.mxu0 %v2399_v20 }
0x2284   :  { %v1506_v2 = vpop.permute.xlu1 %1505 }
0x2285   :  { %v1508_v34 = vmul.f32 %v1506_v2, %v1502_v63 }
0x2287   :  { %1510 = vrot.lane.b32.xlu1 %v1508_v34, %s2186_s3 }
0x22f9   :  { %v1511_v3 = vpop.permute.xlu1 %1510 }
0x22fa   :  { %v1513_v4 = vadd.f32 %v1511_v3, %v1503_v5 }
0x22fc   :  { %2176 = vtanh.f32 %v1513_v4 }
0x2306   :  { %v2177_v59 = vpop.eup %2176 }
0x2307   :  { %1516 = vrot.lane.b32.xlu1 %v2177_v59, %s2185_s2 }
0x2379   :  { %v1517_v19 = vpop.permute.xlu1 %1516 }
0x237a   :  { %v1519_v7 = vmul.f32 %v1517_v19, %v1502_v63 }
0x237c   :  { %v1568_v8 = vpack.c.bf16 %v1519_v7, %v1519_v7 }
0x237e   :  { %1570 = vrot.lane.b32.xlu1 %v1568_v8, %s2186_s3 }
0x23f0   :  { %v1571_v0 = vpop.permute.xlu1 %1570 }
0x23f1   :  { %2046 = vmatmul.mubr.msk.bf16.vlgmr.msra.gmra.mrb[32].mxu0 %vm147_vm3, %v1571_v0 }
0x24c4   :  { %v1609_v20 = vpop.f32.mrb[32].mxu0 }
0x24c5   :  { %v2073_v10 = vadd.f32 %v2426_v25, %v1609_v20  ;;  %v2047_v12 = vpop.f32.mrb[33].mxu0  ;;  %v1645_v25 = vld [vmem:[%s2609_s7] sm:$0xff] }
0x24c6   :  { %v1612_v14 = vpop.f32.mrb[34].mxu0  ;;  %v2061_v16 = vpack.c.bf16 %v1646_v28, %v1645_v25 }
0x24c7   :  { %2178 = vtanh.f32 %v2073_v10  ;;  %v2048_v15 = vpop.f32.mrb[35].mxu0 }
0x24c8   :  { %2062 = vmatpush3.bf16.msra.mxu1 %v2061_v16 }
0x24c9   :  { %2063 = vmatprep.subr.bf16.mxu1 %v2187_v27 }
0x24cc   :  { %2065 = vmatpush3.bf16.msra.mxu1 %v2064_v54 }
0x24d1   :  { %v2179_v6 = vpop.eup %2178 }
0x24d2   :  { %1621 = vrot.lane.b32.xlu0 %v2179_v6, %s2185_s2  ;;  %v1617_v29 = vmul.f32 0.5, %v2179_v6 }
0x24d4   :  { %v1618_v21 = vadd.f32 0.5, %v1617_v29 }
0x24d6   :  { %v1619_v24 = vmul.f32 %v1618_v21, %v1513_v4 }
0x2544   :  { %v1622_v22 = vpop.permute.xlu0 %1621 }
0x2545   :  { %v1624_v23 = vmul.f32 %v1622_v22, %v1618_v21 }
0x2547   :  { %1626 = vrot.lane.b32.xlu1 %v1624_v23, %s2186_s3 }
0x25b9   :  { %v1627_v13 = vpop.permute.xlu1 %1626 }
0x25ba   :  { %v1629_v26 = vadd.f32 %v1627_v13, %v1619_v24 }
0x25bc   :  { %2180 = vtanh.f32 %v1629_v26 }
0x25c6   :  { %v2181_v31 = vpop.eup %2180 }
0x25c7   :  { %1632 = vrot.lane.b32.xlu0 %v2181_v31, %s2185_s2 }
0x2639   :  { %v1633_v32 = vpop.permute.xlu0 %1632 }
0x263a   :  { %v1635_v33 = vmul.f32 %v1633_v32, %v1618_v21 }
0x263c   :  { %v1640_v36 = vrot.slane %v1635_v33, 6 }
0x263e   :  { %v1643_v37 = vsel %vm1642_vm4, %v1637_v35, %v1640_v36 }
0x263f   :  { %v1644_v38 = vmax.f32 %v1643_v37, 0.0 }
0x2641   :  { %1657 = vrot.lane.b32.xlu1 %v1644_v38, %s2186_s3 }
0x26b3   :  { %v1658_v39 = vpop.permute.xlu1 %1657 }
0x26b4   :  { %2058 = vmatmul.mubr.msk.f32.vlgmr.msra.gmra.mrb[32].mxu1 %vm147_vm3, %v1658_v39 }
0x2787   :  { %v1727_v41 = vpop.f32.mrb[32].mxu1 }
0x2788   :  { %v1728_v42 = vadd.f32 %v1770_v40, %v1727_v41  ;;  %v2059_v43 = vpop.f32.mrb[33].mxu1 }
0x278a   :  { %1732 = vst.msk [vmem:[%s2611_s9] sm:$0xf] %vm1731_vm5, %v1728_v42 }

</bundles_post_ra>
